<compile_context>
chip_gen: v7x
topology: tpu7x:2x2x1
jax: 0.10.0
libtpu: 0.0.40
codegen_flags: <defaults>
</compile_context>

<pallas_src>
import functools

import jax
import jax.numpy as jnp
import numpy as np
from jax.experimental import pallas as pl
from jax.experimental.pallas import tpu as pltpu

# ---- Problem sizes (small but lane-dense: heads*out_features = 128) ---------
N_NODES = 128
N_EDGES = 256
IN_FEATURES = 16
OUT_FEATURES = 32
EDGE_FEATURES = 8
HEADS = 4
ALPHA = 0.2           # LeakyReLU negative slope
CONCAT = True


def _gat_kernel(h_ref, wall_ref, ae_ref, rep_ref, eattr_ref, oi_ref, oj_ref,
                out_ref, *, alpha, hd, n_heads):
    """Single-block kernel: everything resident in VMEM.

    h_ref     : [N, IN]          node features
    wall_ref  : [IN, HD+2H]      [W | W@A_dst | W@A_src]  (fused projection)
    ae_ref    : [F, H]           a[:, 2D:].T              (edge-attr attention)
    rep_ref   : [H, HD+1]        [head->head*feature ones-block | ones column]
    eattr_ref : [E, F]           edge features
    oi_ref    : [E, N]           one-hot of edge_index[0] (gather i / scatter)
    oj_ref    : [E, N]           one-hot of edge_index[1] (gather j)
    out_ref   : [N, HD]          ELU(concatenated h_prime)
    """
    f32 = jnp.float32

    # Fused projection (MXU #1): Wh | s_dst | s_src in one pass.
    P = jnp.dot(h_ref[...], wall_ref[...], preferred_element_type=f32)   # [N, HD+2H]

    oi = oi_ref[...]   # [E, N]
    oj = oj_ref[...]   # [E, N]

    # MXU #2: gather dst features and dst-side logits together.
    G = jnp.dot(oj, P[:, :hd + n_heads], preferred_element_type=f32)     # [E, HD+H]
    Wh_j = G[:, :hd]                                                     # [E, HD]

    # Edge logits [E, H]: accumulate src gather (MXU #3) + dst term + edge term (MXU #4).
    e = jnp.dot(oi, P[:, hd + n_heads:], preferred_element_type=f32)
    e = e + G[:, hd:]
    e = e + jnp.dot(eattr_ref[...], ae_ref[...], preferred_element_type=f32)

    # LeakyReLU, then softmax over heads (dim=1), as in the reference module.
    e = jnp.where(e > 0, e, alpha * e)
    m = jnp.max(e, axis=1, keepdims=True)
    p = jnp.exp(e - m)

    # MXU #5: one matmul broadcasts p over the head*feature lanes AND computes
    # the softmax denominator (last column of rep_ref is ones).
    Q = jnp.dot(p, rep_ref[...], preferred_element_type=f32)             # [E, HD+1]
    att_wide = Q[:, :hd] / Q[:, hd:hd + 1]                               # exact divide

    S = att_wide * Wh_j                                                  # [E, HD]

    # MXU #6: scatter-add by contracting the edge axis of oi directly
    # (transposed-LHS contraction; no oi_T operand needed).
    hp = jax.lax.dot_general(oi, S, (((0,), (0,)), ((), ())),
                             preferred_element_type=f32)                 # [N, HD]

    # ELU (concat=True branch); clamp the discarded exp branch.
    out_ref[...] = jnp.where(hp > 0, hp, jnp.exp(jnp.minimum(hp, 0.0)) - 1.0)


@functools.partial(jax.jit, static_argnames=("heads", "out_features", "alpha"))
def multi_head_gat_forward(h, W, a, edge_index, edge_attr,
                           *, heads, out_features, alpha):
    """Builds one-hots + folded attention/projection weights (glue, fused into
    the same jit region as the pallas_call) and invokes the kernel."""
    N = h.shape[0]
    D = out_features
    H = heads
    HD = H * D

    ei0 = edge_index[0]
    ei1 = edge_index[1]
    node_ids = jnp.arange(N, dtype=ei0.dtype)
    oi = (ei0[:, None] == node_ids[None, :]).astype(jnp.float32)         # [E, N]
    oj = (ei1[:, None] == node_ids[None, :]).astype(jnp.float32)         # [E, N]

    eye = jnp.eye(H, dtype=jnp.float32)
    A_src = jnp.einsum('hd,hk->hdk', a[:, :D], eye).reshape(HD, H)       # [HD, H]
    A_dst = jnp.einsum('hd,hk->hdk', a[:, D:2 * D], eye).reshape(HD, H)  # [HD, H]
    A_e = jnp.transpose(a[:, 2 * D:])                                    # [F, H]

    # Fold attention projections into the node projection (parameter-only fold).
    W_all = jnp.concatenate([W, W @ A_dst, W @ A_src], axis=1)           # [IN, HD+2H]

    # Head -> head*feature broadcast plus softmax-denominator column.
    rep = jnp.kron(eye, jnp.ones((1, D), jnp.float32))                   # [H, HD]
    rep_plus = jnp.concatenate([rep, jnp.ones((H, 1), jnp.float32)], axis=1)  # [H, HD+1]

    kernel = functools.partial(_gat_kernel, alpha=alpha, hd=HD, n_heads=H)

    return pl.pallas_call(
        kernel,
        out_shape=jax.ShapeDtypeStruct((N, HD), jnp.float32),
        in_specs=[pl.BlockSpec(memory_space=pltpu.MemorySpace.VMEM)] * 7,
        out_specs=pl.BlockSpec(memory_space=pltpu.MemorySpace.VMEM),
    )(h, W_all, A_e, rep_plus, edge_attr, oi, oj)


def _xavier_uniform(key, shape, gain):
    # PyTorch xavier_uniform_ on a 2-D tensor: fan_out = shape[0], fan_in = shape[1]
    fan_out, fan_in = shape[0], shape[1]
    bound = gain * np.sqrt(6.0 / (fan_in + fan_out))
    return jax.random.uniform(key, shape, dtype=jnp.float32,
                              minval=-bound, maxval=bound)


def _reference(h, W, a, edge_index, edge_attr, *, heads, out_features, alpha):
    """Pure-JAX mirror of the PyTorch forward (concat=True, no dropout)."""
    N = h.shape[0]
    D = out_features
    Wh = (h @ W).reshape(N, heads, D)
    ei0, ei1 = edge_index[0], edge_index[1]
    Wh_i = Wh[ei0]
    Wh_j = Wh[ei1]
    ea = jnp.repeat(edge_attr[:, None, :], heads, axis=1)
    a_in = jnp.concatenate([Wh_i, Wh_j, ea], axis=2)          # [E, H, 2D+F]
    e = jnp.einsum('ehd,hd->eh', a_in, a)
    e = jnp.where(e > 0, e, alpha * e)
    att = jax.nn.softmax(e, axis=1)
    h_prime = jnp.zeros((N, heads, D), jnp.float32).at[ei0].add(att[:, :, None] * Wh_j)
    return jax.nn.elu(h_prime.reshape(N, heads * D))


if __name__ == "__main__":
    key = jax.random.PRNGKey(0)
    k_h, k_w, k_a, k_e0, k_e1, k_ea = jax.random.split(key, 6)

    h = jax.random.normal(k_h, (N_NODES, IN_FEATURES), dtype=jnp.float32)
    W = _xavier_uniform(k_w, (IN_FEATURES, HEADS * OUT_FEATURES), gain=1.414)
    a = _xavier_uniform(k_a, (HEADS, 2 * OUT_FEATURES + EDGE_FEATURES), gain=1.414)
    edge_index = jnp.stack([
        jax.random.randint(k_e0, (N_EDGES,), 0, N_NODES),
        jax.random.randint(k_e1, (N_EDGES,), 0, N_NODES),
    ], axis=0).astype(jnp.int32)
    edge_attr = jax.random.uniform(k_ea, (N_EDGES, EDGE_FEATURES), dtype=jnp.float32)

    out = multi_head_gat_forward(h, W, a, edge_index, edge_attr,
                                 heads=HEADS, out_features=OUT_FEATURES, alpha=ALPHA)
    out = jax.block_until_ready(out)

    ref = _reference(h, W, a, edge_index, edge_attr,
                     heads=HEADS, out_features=OUT_FEATURES, alpha=ALPHA)
    np.testing.assert_allclose(np.asarray(out), np.asarray(ref), rtol=1e-3, atol=1e-3)

    print("KERNEL_OK")
</pallas_src>

<mosaic_0001>
module attributes {stable_mosaic.version = 11 : i64} {
  func.func @_gat_kernel(%arg0: memref<128x16xf32, #tpu.memory_space<vmem>>, %arg1: memref<16x136xf32, #tpu.memory_space<vmem>>, %arg2: memref<8x4xf32, #tpu.memory_space<vmem>>, %arg3: memref<4x129xf32, #tpu.memory_space<vmem>>, %arg4: memref<256x8xf32, #tpu.memory_space<vmem>>, %arg5: memref<256x128xf32, #tpu.memory_space<vmem>>, %arg6: memref<256x128xf32, #tpu.memory_space<vmem>>, %arg7: memref<128x128xf32, #tpu.memory_space<vmem>>) attributes {dimension_semantics = [], scalar_prefetch = 0 : i64, scratch_operands = 0 : i64, tpu.core_type = #tpu.core_type<tc>} {
    %c0 = arith.constant 0 : index
    %c0_0 = arith.constant 0 : index
    %0 = vector.load %arg0[%c0, %c0_0] : memref<128x16xf32, #tpu.memory_space<vmem>>, vector<128x16xf32>
    %c0_1 = arith.constant 0 : index
    %c0_2 = arith.constant 0 : index
    %1 = vector.load %arg1[%c0_1, %c0_2] : memref<16x136xf32, #tpu.memory_space<vmem>>, vector<16x136xf32>
    %cst = arith.constant dense<0.000000e+00> : vector<128x136xf32>
    %2 = tpu.matmul %0, %1, %cst {dimension_numbers = #tpu.dot_dimension_numbers<[1], [0], [0], [1], [0, 0, 1, 1], [], []>} : vector<128x16xf32>, vector<16x136xf32>, vector<128x136xf32> -> vector<128x136xf32>
    %c0_3 = arith.constant 0 : index
    %c0_4 = arith.constant 0 : index
    %3 = vector.load %arg5[%c0_3, %c0_4] : memref<256x128xf32, #tpu.memory_space<vmem>>, vector<256x128xf32>
    %c0_5 = arith.constant 0 : index
    %c0_6 = arith.constant 0 : index
    %4 = vector.load %arg6[%c0_5, %c0_6] : memref<256x128xf32, #tpu.memory_space<vmem>>, vector<256x128xf32>
    %5 = vector.extract_strided_slice %2 {offsets = [0, 0], sizes = [128, 132], strides = [1, 1]} : vector<128x136xf32> to vector<128x132xf32>
    %cst_7 = arith.constant dense<0.000000e+00> : vector<256x132xf32>
    %6 = tpu.matmul %4, %5, %cst_7 {dimension_numbers = #tpu.dot_dimension_numbers<[1], [0], [0], [1], [0, 0, 1, 1], [], []>} : vector<256x128xf32>, vector<128x132xf32>, vector<256x132xf32> -> vector<256x132xf32>
    %7 = vector.extract_strided_slice %6 {offsets = [0, 0], sizes = [256, 128], strides = [1, 1]} : vector<256x132xf32> to vector<256x128xf32>
    %8 = vector.extract_strided_slice %2 {offsets = [0, 132], sizes = [128, 4], strides = [1, 1]} : vector<128x136xf32> to vector<128x4xf32>
    %cst_8 = arith.constant dense<0.000000e+00> : vector<256x4xf32>
    %9 = tpu.matmul %3, %8, %cst_8 {dimension_numbers = #tpu.dot_dimension_numbers<[1], [0], [0], [1], [0, 0, 1, 1], [], []>} : vector<256x128xf32>, vector<128x4xf32>, vector<256x4xf32> -> vector<256x4xf32>
    %10 = vector.extract_strided_slice %6 {offsets = [0, 128], sizes = [256, 4], strides = [1, 1]} : vector<256x132xf32> to vector<256x4xf32>
    %11 = arith.addf %9, %10 : vector<256x4xf32>
    %c0_9 = arith.constant 0 : index
    %c0_10 = arith.constant 0 : index
    %12 = vector.load %arg4[%c0_9, %c0_10] : memref<256x8xf32, #tpu.memory_space<vmem>>, vector<256x8xf32>
    %c0_11 = arith.constant 0 : index
    %c0_12 = arith.constant 0 : index
    %13 = vector.load %arg2[%c0_11, %c0_12] : memref<8x4xf32, #tpu.memory_space<vmem>>, vector<8x4xf32>
    %cst_13 = arith.constant dense<0.000000e+00> : vector<256x4xf32>
    %14 = tpu.matmul %12, %13, %cst_13 {dimension_numbers = #tpu.dot_dimension_numbers<[1], [0], [0], [1], [0, 0, 1, 1], [], []>} : vector<256x8xf32>, vector<8x4xf32>, vector<256x4xf32> -> vector<256x4xf32>
    %15 = arith.addf %11, %14 : vector<256x4xf32>
    %cst_14 = arith.constant 0.000000e+00 : f32
    %16 = vector.broadcast %cst_14 : f32 to vector<256x4xf32>
    %17 = arith.cmpf ogt, %15, %16 : vector<256x4xf32>
    %cst_15 = arith.constant 2.000000e-01 : f32
    %18 = vector.broadcast %cst_15 : f32 to vector<256x4xf32>
    %19 = arith.mulf %18, %15 : vector<256x4xf32>
    %20 = arith.select %17, %15, %19 : vector<256x4xi1>, vector<256x4xf32>
    %cst_16 = arith.constant dense<0xFF800000> : vector<256xf32>
    %21 = vector.multi_reduction <maximumf>, %20, %cst_16 [1] : vector<256x4xf32> to vector<256xf32>
    %22 = vector.shape_cast %21 : vector<256xf32> to vector<256x1xf32>
    %23 = vector.broadcast %22 : vector<256x1xf32> to vector<256x4xf32>
    %24 = arith.subf %20, %23 : vector<256x4xf32>
    %25 = math.exp %24 : vector<256x4xf32>
    %c0_17 = arith.constant 0 : index
    %c0_18 = arith.constant 0 : index
    %26 = vector.load %arg3[%c0_17, %c0_18] : memref<4x129xf32, #tpu.memory_space<vmem>>, vector<4x129xf32>
    %cst_19 = arith.constant dense<0.000000e+00> : vector<256x129xf32>
    %27 = tpu.matmul %25, %26, %cst_19 {dimension_numbers = #tpu.dot_dimension_numbers<[1], [0], [0], [1], [0, 0, 1, 1], [], []>} : vector<256x4xf32>, vector<4x129xf32>, vector<256x129xf32> -> vector<256x129xf32>
    %28 = vector.extract_strided_slice %27 {offsets = [0, 0], sizes = [256, 128], strides = [1, 1]} : vector<256x129xf32> to vector<256x128xf32>
    %29 = vector.extract_strided_slice %27 {offsets = [0, 128], sizes = [256, 1], strides = [1, 1]} : vector<256x129xf32> to vector<256x1xf32>
    %30 = vector.broadcast %29 : vector<256x1xf32> to vector<256x128xf32>
    %31 = arith.divf %28, %30 : vector<256x128xf32>
    %32 = arith.mulf %31, %7 : vector<256x128xf32>
    %cst_20 = arith.constant dense<0.000000e+00> : vector<128x128xf32>
    %33 = tpu.matmul %3, %32, %cst_20 {dimension_numbers = #tpu.dot_dimension_numbers<[0], [0], [1], [1], [0, 1, 1, 1], [], []>} : vector<256x128xf32>, vector<256x128xf32>, vector<128x128xf32> -> vector<128x128xf32>
    %cst_21 = arith.constant 0.000000e+00 : f32
    %34 = vector.broadcast %cst_21 : f32 to vector<128x128xf32>
    %35 = arith.cmpf ogt, %33, %34 : vector<128x128xf32>
    %cst_22 = arith.constant 0.000000e+00 : f32
    %36 = vector.broadcast %cst_22 : f32 to vector<128x128xf32>
    %37 = arith.minimumf %33, %36 : vector<128x128xf32>
    %38 = math.exp %37 : vector<128x128xf32>
    %cst_23 = arith.constant 1.000000e+00 : f32
    %39 = vector.broadcast %cst_23 : f32 to vector<128x128xf32>
    %40 = arith.subf %38, %39 : vector<128x128xf32>
    %41 = arith.select %35, %33, %40 : vector<128x128xi1>, vector<128x128xf32>
    %c0_24 = arith.constant 0 : index
    %c0_25 = arith.constant 0 : index
    %42 = vector.load %arg7[%c0_24, %c0_25] : memref<128x128xf32, #tpu.memory_space<vmem>>, vector<128x128xf32>
    tpu.vector_store %arg7[%c0_24, %c0_25], %41 {strides = array<i32>} : memref<128x128xf32, #tpu.memory_space<vmem>>, vector<128x128xf32>,
    return
  }
}

</mosaic_0001>

<bundles_post_ra>
// kernel: multi_head_gat_forward.1
= control target key start
LH: loop header
LB: loop body
LE: loop exit
PB: predicated region body
PF: predicated region fallthrough
CT: control target
= control target key end

     0   :  { %v4645_v5 = vmov 0.0   ;;  %vm47_vm0 = vcmask 130048   ;;  %s4637_s0 = inlined_call_operand.vmem [shape: f32[128,16], index: 0, kind: input, shape index: {}]   ;;  %s4638_s1 = inlined_call_operand.vmem [shape: f32[16,136], index: 1, kind: input, shape index: {}]   ;;  %s4639_s2 = inlined_call_operand.vmem [shape: f32[8,4], index: 2, kind: input, shape index: {}]   ;;  %s4640_s3 = inlined_call_operand.vmem [shape: f32[4,129], index: 3, kind: input, shape index: {}]   ;;  %s4641_s4 = inlined_call_operand.vmem [shape: f32[256,8], index: 4, kind: input, shape index: {}]   ;;  %s4642_s5 = inlined_call_operand.vmem [shape: f32[256,128], index: 5, kind: input, shape index: {}]   ;;  %s4643_s6 = inlined_call_operand.vmem [shape: f32[256,128], index: 6, kind: input, shape index: {}]   ;;  %s4644_s7 = inlined_call_operand.hbm [shape: f32[128,128], index: 7, kind: output, shape index: {}]  }
   0x1   :  { %v44_v0 = vld [vmem:[%s4638_s1 + $0x8] sm:$0xff]  ;;  %v46_v1 = vld [vmem:[%s4638_s1 + $0x18] sm:$0xff]  ;;  %v43_v2 = vld [vmem:[%s4638_s1] sm:$0xff]  ;;  %160 = vmatprep.mubr.f32.mxu0 %v4645_v5  ;;  %385 = vmatprep.mubr.f32.mxu1 %v4645_v5 }
   0x2   :  { %v2886_v3 = vpack.c.bf16 %v46_v1, %v44_v0  ;;  %v45_v4 = vld [vmem:[%s4638_s1 + $0x10] sm:$0xff]  ;;  %v27_v7 = vld [vmem:[%s4637_s0] sm:$0xff] }
   0x3   :  { %v2888_v6 = vpack.c.bf16 %v45_v4, %v43_v2 }
   0x4   :  { %2887 = vmatprep.subr.bf16.mxu0 %v2886_v3 }
   0x5   :  { %2889 = vmatpush1.bf16.msra.mxu0 %v2888_v6 }
   0x6   :  { %12 = vsyncpa [#allocation3], 0  ;;  %v28_v8 = vld [vmem:[%s4637_s0 + $0x8] sm:$0xff]  ;;  %v29_v9 = vld [vmem:[%s4637_s0 + $0x10] sm:$0xff]  ;;  %s3364_s16 = smov 124   ;;  %vm900_vm1 = vcmask 64512  }
   0x7   :  { %v30_v10 = vld [vmem:[%s4637_s0 + $0x18] sm:$0xff]  ;;  %v31_v11 = vld [vmem:[%s4637_s0 + $0x20] sm:$0xff]  ;;  %v32_v12 = vld [vmem:[%s4637_s0 + $0x28] sm:$0xff]  ;;  %vm1642_vm2 = vcmask 1043456   ;;  %vm1350_vm4 = vcmask 31744  }
   0x8   :  { %2497 = vmatmul.mubr.msk.f32.vlgmr.msra.gmra.mrb[0].mxu0 %vm47_vm0, %v27_v7  ;;  %v33_v13 = vld [vmem:[%s4637_s0 + $0x30] sm:$0xff]  ;;  %v34_v14 = vld [vmem:[%s4637_s0 + $0x38] sm:$0xff]  ;;  %v35_v15 = vld [vmem:[%s4637_s0 + $0x40] sm:$0xff] }
   0x9   :  { %166 = vmatprep.mubr.f32.mxu0 %v4645_v5  ;;  %v36_v16 = vld [vmem:[%s4637_s0 + $0x48] sm:$0xff]  ;;  %v37_v17 = vld [vmem:[%s4637_s0 + $0x50] sm:$0xff]  ;;  %v38_v18 = vld [vmem:[%s4637_s0 + $0x58] sm:$0xff] }
   0xa   :  { %v39_v19 = vld [vmem:[%s4637_s0 + $0x60] sm:$0xff]  ;;  %v40_v20 = vld [vmem:[%s4637_s0 + $0x68] sm:$0xff]  ;;  %v41_v21 = vld [vmem:[%s4637_s0 + $0x70] sm:$0xff] }
   0xb   :  { %v42_v22 = vld [vmem:[%s4637_s0 + $0x78] sm:$0xff] }
   0xc   :  { %2498 = vmatmul.mubr.msk.f32.gmra.mrb[2].mxu0 %vm47_vm0, %v28_v8 }
   0xd   :  { %172 = vmatprep.mubr.f32.mxu0 %v4645_v5 }
  0x10   :  { %2499 = vmatmul.mubr.msk.f32.gmra.mrb[4].mxu0 %vm47_vm0, %v29_v9 }
  0x11   :  { %178 = vmatprep.mubr.f32.mxu0 %v4645_v5 }
  0x14   :  { %2500 = vmatmul.mubr.msk.f32.gmra.mrb[6].mxu0 %vm47_vm0, %v30_v10  ;;  %v257_v10 = vld [vmem:[%s4642_s5] sm:$0xff] }
  0x15   :  { %184 = vmatprep.mubr.f32.mxu0 %v4645_v5 }
  0x18   :  { %2501 = vmatmul.mubr.msk.f32.gmra.mrb[8].mxu0 %vm47_vm0, %v31_v11 }
  0x19   :  { %190 = vmatprep.mubr.f32.mxu0 %v4645_v5 }
  0x1c   :  { %2502 = vmatmul.mubr.msk.f32.gmra.mrb[10].mxu0 %vm47_vm0, %v32_v12 }
  0x1d   :  { %196 = vmatprep.mubr.f32.mxu0 %v4645_v5 }
  0x20   :  { %2503 = vmatmul.mubr.msk.f32.gmra.mrb[12].mxu0 %vm47_vm0, %v33_v13 }
  0x21   :  { %202 = vmatprep.mubr.f32.mxu0 %v4645_v5 }
  0x24   :  { %2504 = vmatmul.mubr.msk.f32.gmra.mrb[14].mxu0 %vm47_vm0, %v34_v14 }
  0x25   :  { %208 = vmatprep.mubr.f32.mxu0 %v4645_v5 }
  0x28   :  { %2505 = vmatmul.mubr.msk.f32.gmra.mrb[16].mxu0 %vm47_vm0, %v35_v15 }
  0x29   :  { %214 = vmatprep.mubr.f32.mxu0 %v4645_v5 }
  0x2c   :  { %2506 = vmatmul.mubr.msk.f32.gmra.mrb[18].mxu0 %vm47_vm0, %v36_v16 }
  0x2d   :  { %220 = vmatprep.mubr.f32.mxu0 %v4645_v5 }
  0x30   :  { %2507 = vmatmul.mubr.msk.f32.gmra.mrb[20].mxu0 %vm47_vm0, %v37_v17  ;;  %v289_v17 = vld [vmem:[%s4643_s6] sm:$0xff] }
  0x31   :  { %226 = vmatprep.mubr.f32.mxu0 %v4645_v5 }
  0x34   :  { %2508 = vmatmul.mubr.msk.f32.gmra.mrb[22].mxu0 %vm47_vm0, %v38_v18  ;;  %v290_v18 = vld [vmem:[%s4643_s6 + $0x8] sm:$0xff] }
  0x35   :  { %232 = vmatprep.mubr.f32.mxu0 %v4645_v5 }
  0x38   :  { %2509 = vmatmul.mubr.msk.f32.gmra.mrb[24].mxu0 %vm47_vm0, %v39_v19  ;;  %v291_v19 = vld [vmem:[%s4643_s6 + $0x10] sm:$0xff] }
  0x39   :  { %238 = vmatprep.mubr.f32.mxu0 %v4645_v5 }
  0x3c   :  { %2510 = vmatmul.mubr.msk.f32.gmra.mrb[26].mxu0 %vm47_vm0, %v40_v20  ;;  %v292_v20 = vld [vmem:[%s4643_s6 + $0x18] sm:$0xff] }
  0x3d   :  { %244 = vmatprep.mubr.f32.mxu0 %v4645_v5 }
  0x40   :  { %2511 = vmatmul.mubr.msk.f32.gmra.mrb[28].mxu0 %vm47_vm0, %v41_v21  ;;  %v293_v21 = vld [vmem:[%s4643_s6 + $0x20] sm:$0xff] }
  0x41   :  { %250 = vmatprep.mubr.f32.mxu0 %v4645_v5 }
  0x44   :  { %2512 = vmatmul.mubr.msk.f32.gmra.mrb[30].mxu0 %vm47_vm0, %v42_v22  ;;  %v294_v22 = vld [vmem:[%s4643_s6 + $0x28] sm:$0xff] }
  0x45   :  { %2788 = vmatprep.mubr.f32.mxu0 %v257_v10  ;;  %v317_v10 = vld [vmem:[%s4643_s6 + $0xe0] sm:$0xff] }
  0xdb   :  { %v162_v23 = vpop.f32.mrb[0].mxu0 }
  0xdc   :  { %v164_v24 = vpop.f32.mrb[1].mxu0 }
  0xdf   :  { %v168_v25 = vpop.f32.mrb[2].mxu0 }
  0xe0   :  { %v2892_v26 = vpack.c.bf16 %v168_v25, %v162_v23  ;;  %v170_v27 = vpop.f32.mrb[3].mxu0  ;;  %v295_v23 = vld [vmem:[%s4643_s6 + $0x30] sm:$0xff]  ;;  %v297_v25 = vld [vmem:[%s4643_s6 + $0x40] sm:$0xff] }
  0xe1   :  { %v2992_v28 = vpack.i.bf16 %v170_v27, %v164_v24  ;;  %v2890_v29 = vpack.c.bf16 %v170_v27, %v164_v24  ;;  %v296_v24 = vld [vmem:[%s4643_s6 + $0x38] sm:$0xff]  ;;  %v299_v27 = vld [vmem:[%s4643_s6 + $0x50] sm:$0xff] }
  0xe3   :  { %2993 = vrot.lane.b32.xlu0 %v2992_v28, %s3364_s16  ;;  %v174_v30 = vpop.f32.mrb[4].mxu0  ;;  %2891 = vmatprep.subr.bf16.mxu1 %v2890_v29  ;;  %v300_v28 = vld [vmem:[%s4643_s6 + $0x58] sm:$0xff]  ;;  %v301_v29 = vld [vmem:[%s4643_s6 + $0x60] sm:$0xff] }
  0xe4   :  { %v176_v31 = vpop.f32.mrb[5].mxu0  ;;  %2893 = vmatpush1.bf16.msra.mxu1 %v2892_v26  ;;  %v298_v26 = vld [vmem:[%s4643_s6 + $0x48] sm:$0xff] }
  0xe7   :  { %v180_v32 = vpop.f32.mrb[6].mxu0 }
  0xe8   :  { %v2896_v33 = vpack.c.bf16 %v180_v32, %v174_v30  ;;  %v182_v34 = vpop.f32.mrb[7].mxu0  ;;  %v302_v30 = vld [vmem:[%s4643_s6 + $0x68] sm:$0xff] }
  0xe9   :  { %v2997_v35 = vpack.i.bf16 %v182_v34, %v176_v31  ;;  %v2894_v36 = vpack.c.bf16 %v182_v34, %v176_v31  ;;  %v303_v31 = vld [vmem:[%s4643_s6 + $0x70] sm:$0xff] }
  0xeb   :  { %2998 = vrot.lane.b32.xlu0 %v2997_v35, %s3364_s16  ;;  %v186_v37 = vpop.f32.mrb[8].mxu0  ;;  %2895 = vmatprep.subr.bf16.mxu1 %v2894_v36  ;;  %v304_v36 = vld [vmem:[%s4643_s6 + $0x78] sm:$0xff] }
  0xec   :  { %v188_v38 = vpop.f32.mrb[9].mxu0  ;;  %2897 = vmatpush1.bf16.msra.mxu1 %v2896_v33 }
  0xef   :  { %v192_v39 = vpop.f32.mrb[10].mxu0 }
  0xf0   :  { %v2900_v40 = vpack.c.bf16 %v192_v39, %v186_v37  ;;  %v194_v41 = vpop.f32.mrb[11].mxu0  ;;  %v305_v37 = vld [vmem:[%s4643_s6 + $0x80] sm:$0xff] }
  0xf1   :  { %v2898_v42 = vpack.c.bf16 %v194_v41, %v188_v38  ;;  %v3002_v43 = vpack.i.bf16 %v194_v41, %v188_v38 }
  0xf3   :  { %3003 = vrot.lane.b32.xlu1 %v3002_v43, %s3364_s16  ;;  %v198_v44 = vpop.f32.mrb[12].mxu0  ;;  %2899 = vmatprep.subr.bf16.mxu1 %v2898_v42  ;;  %v306_v42 = vld [vmem:[%s4643_s6 + $0x88] sm:$0xff]  ;;  %v307_v43 = vld [vmem:[%s4643_s6 + $0x90] sm:$0xff] }
  0xf4   :  { %v200_v45 = vpop.f32.mrb[13].mxu0  ;;  %2901 = vmatpush1.bf16.msra.mxu1 %v2900_v40 }
  0xf7   :  { %v204_v46 = vpop.f32.mrb[14].mxu0 }
  0xf8   :  { %v2904_v47 = vpack.c.bf16 %v204_v46, %v198_v44  ;;  %v206_v48 = vpop.f32.mrb[15].mxu0 }
  0xf9   :  { %v3007_v49 = vpack.i.bf16 %v206_v48, %v200_v45  ;;  %v2902_v50 = vpack.c.bf16 %v206_v48, %v200_v45  ;;  %v308_v48 = vld [vmem:[%s4643_s6 + $0x98] sm:$0xff] }
  0xfb   :  { %3008 = vrot.lane.b32.xlu1 %v3007_v49, %s3364_s16  ;;  %v210_v51 = vpop.f32.mrb[16].mxu0  ;;  %2903 = vmatprep.subr.bf16.mxu1 %v2902_v50  ;;  %v309_v49 = vld [vmem:[%s4643_s6 + $0xa0] sm:$0xff] }
  0xfc   :  { %v212_v52 = vpop.f32.mrb[17].mxu0  ;;  %2905 = vmatpush1.bf16.msra.mxu1 %v2904_v47 }
  0xff   :  { %v216_v53 = vpop.f32.mrb[18].mxu0 }
 0x100   :  { %v2908_v54 = vpack.c.bf16 %v216_v53, %v210_v51  ;;  %v218_v55 = vpop.f32.mrb[19].mxu0 }
 0x101   :  { %v3012_v56 = vpack.i.bf16 %v218_v55, %v212_v52  ;;  %v2906_v57 = vpack.c.bf16 %v218_v55, %v212_v52  ;;  %v311_v55 = vld [vmem:[%s4643_s6 + $0xb0] sm:$0xff] }
 0x103   :  { %3013 = vrot.lane.b32.xlu0 %v3012_v56, %s3364_s16  ;;  %v222_v58 = vpop.f32.mrb[20].mxu0  ;;  %2907 = vmatprep.subr.bf16.mxu1 %v2906_v57 }
 0x104   :  { %v224_v59 = vpop.f32.mrb[21].mxu0  ;;  %2909 = vmatpush1.bf16.msra.mxu1 %v2908_v54  ;;  %v310_v54 = vld [vmem:[%s4643_s6 + $0xa8] sm:$0xff] }
 0x107   :  { %v228_v60 = vpop.f32.mrb[22].mxu0 }
 0x108   :  { %v2912_v61 = vpack.c.bf16 %v228_v60, %v222_v58  ;;  %v230_v62 = vpop.f32.mrb[23].mxu0  ;;  %v312_v60 = vld [vmem:[%s4643_s6 + $0xb8] sm:$0xff] }
 0x109   :  { %v3017_v63 = vpack.i.bf16 %v230_v62, %v224_v59  ;;  %v2910_v0 = vpack.c.bf16 %v230_v62, %v224_v59 }
 0x10b   :  { %3018 = vrot.lane.b32.xlu1 %v3017_v63, %s3364_s16  ;;  %v234_v1 = vpop.f32.mrb[24].mxu0  ;;  %2911 = vmatprep.subr.bf16.mxu1 %v2910_v0 }
 0x10c   :  { %v236_v2 = vpop.f32.mrb[25].mxu0  ;;  %2913 = vmatpush1.bf16.msra.mxu1 %v2912_v61  ;;  %v313_v61 = vld [vmem:[%s4643_s6 + $0xc0] sm:$0xff] }
 0x10f   :  { %v240_v3 = vpop.f32.mrb[26].mxu0 }
 0x110   :  { %v2916_v4 = vpack.c.bf16 %v240_v3, %v234_v1  ;;  %v242_v6 = vpop.f32.mrb[27].mxu0  ;;  %v315_v3 = vld [vmem:[%s4643_s6 + $0xd0] sm:$0xff] }
 0x111   :  { %v3022_v7 = vpack.i.bf16 %v242_v6, %v236_v2  ;;  %v2914_v8 = vpack.c.bf16 %v242_v6, %v236_v2  ;;  %v314_v2 = vld [vmem:[%s4643_s6 + $0xc8] sm:$0xff] }
 0x113   :  { %3023 = vrot.lane.b32.xlu0 %v3022_v7, %s3364_s16  ;;  %v246_v9 = vpop.f32.mrb[28].mxu0  ;;  %2915 = vmatprep.subr.bf16.mxu1 %v2914_v8 }
 0x114   :  { %v248_v11 = vpop.f32.mrb[29].mxu0  ;;  %2917 = vmatpush1.bf16.msra.mxu1 %v2916_v4 }
 0x117   :  { %v252_v12 = vpop.f32.mrb[30].mxu0 }
 0x118   :  { %v2920_v13 = vpack.c.bf16 %v252_v12, %v246_v9  ;;  %v254_v14 = vpop.f32.mrb[31].mxu0  ;;  %v316_v9 = vld [vmem:[%s4643_s6 + $0xd8] sm:$0xff] }
 0x119   :  { %v3027_v15 = vpack.i.bf16 %v254_v14, %v248_v11  ;;  %v2918_v16 = vpack.c.bf16 %v254_v14, %v248_v11 }
 0x11b   :  { %3028 = vrot.lane.b32.xlu1 %v3027_v15, %s3364_s16  ;;  %2919 = vmatprep.subr.bf16.mxu1 %v2918_v16  ;;  %v318_v15 = vld [vmem:[%s4643_s6 + $0xe8] sm:$0xff]  ;;  %v899_v16 = vld [vmem:[%s4639_s2] sm:$0xff] }
 0x11c   :  { %2921 = vmatpush1.bf16.msra.mxu1 %v2920_v13 }
 0x11f   :  { %386 = vmatmul.mubr.f32.vlgmr.msra.gmra.mrb[0].mxu1 %v289_v17  ;;  %v258_v17 = vld [vmem:[%s4642_s5 + $0x8] sm:$0xff] }
 0x120   :  { %391 = vmatprep.mubr.f32.mxu1 %v4645_v5 }
 0x123   :  { %392 = vmatmul.mubr.f32.gmra.mrb[2].mxu1 %v290_v18  ;;  %v259_v18 = vld [vmem:[%s4642_s5 + $0x10] sm:$0xff] }
 0x124   :  { %397 = vmatprep.mubr.f32.mxu1 %v4645_v5 }
 0x127   :  { %398 = vmatmul.mubr.f32.gmra.mrb[4].mxu1 %v291_v19  ;;  %v319_v19 = vld [vmem:[%s4643_s6 + $0xf0] sm:$0xff] }
 0x128   :  { %403 = vmatprep.mubr.f32.mxu1 %v4645_v5 }
 0x12b   :  { %404 = vmatmul.mubr.f32.gmra.mrb[6].mxu1 %v292_v20  ;;  %v260_v20 = vld [vmem:[%s4642_s5 + $0x18] sm:$0xff] }
 0x12c   :  { %409 = vmatprep.mubr.f32.mxu1 %v4645_v5 }
 0x12f   :  { %410 = vmatmul.mubr.f32.gmra.mrb[8].mxu1 %v293_v21  ;;  %v261_v21 = vld [vmem:[%s4642_s5 + $0x20] sm:$0xff] }
 0x130   :  { %415 = vmatprep.mubr.f32.mxu1 %v4645_v5 }
 0x133   :  { %416 = vmatmul.mubr.f32.gmra.mrb[10].mxu1 %v294_v22  ;;  %v320_v22 = vld [vmem:[%s4643_s6 + $0xf8] sm:$0xff] }
 0x134   :  { %421 = vmatprep.mubr.f32.mxu1 %v4645_v5 }
 0x137   :  { %422 = vmatmul.mubr.f32.gmra.mrb[12].mxu1 %v295_v23  ;;  %v262_v23 = vld [vmem:[%s4642_s5 + $0x28] sm:$0xff] }
 0x138   :  { %427 = vmatprep.mubr.f32.mxu1 %v4645_v5 }
 0x13b   :  { %428 = vmatmul.mubr.f32.gmra.mrb[14].mxu1 %v296_v24  ;;  %v263_v24 = vld [vmem:[%s4642_s5 + $0x30] sm:$0xff] }
 0x13c   :  { %433 = vmatprep.mubr.f32.mxu1 %v4645_v5 }
 0x13f   :  { %434 = vmatmul.mubr.f32.gmra.mrb[16].mxu1 %v297_v25  ;;  %v264_v25 = vld [vmem:[%s4642_s5 + $0x38] sm:$0xff] }
 0x140   :  { %439 = vmatprep.mubr.f32.mxu1 %v4645_v5 }
 0x143   :  { %440 = vmatmul.mubr.f32.gmra.mrb[18].mxu1 %v298_v26  ;;  %v265_v26 = vld [vmem:[%s4642_s5 + $0x40] sm:$0xff] }
 0x144   :  { %445 = vmatprep.mubr.f32.mxu1 %v4645_v5 }
 0x147   :  { %446 = vmatmul.mubr.f32.gmra.mrb[20].mxu1 %v299_v27  ;;  %v266_v27 = vld [vmem:[%s4642_s5 + $0x48] sm:$0xff] }
 0x148   :  { %451 = vmatprep.mubr.f32.mxu1 %v4645_v5 }
 0x14b   :  { %452 = vmatmul.mubr.f32.gmra.mrb[22].mxu1 %v300_v28  ;;  %v267_v28 = vld [vmem:[%s4642_s5 + $0x50] sm:$0xff] }
 0x14c   :  { %457 = vmatprep.mubr.f32.mxu1 %v4645_v5 }
 0x14f   :  { %458 = vmatmul.mubr.f32.gmra.mrb[24].mxu1 %v301_v29  ;;  %v268_v29 = vld [vmem:[%s4642_s5 + $0x58] sm:$0xff] }
 0x150   :  { %463 = vmatprep.mubr.f32.mxu1 %v4645_v5 }
 0x153   :  { %464 = vmatmul.mubr.f32.gmra.mrb[26].mxu1 %v302_v30  ;;  %v269_v30 = vld [vmem:[%s4642_s5 + $0x60] sm:$0xff] }
 0x154   :  { %469 = vmatprep.mubr.f32.mxu1 %v4645_v5 }
 0x155   :  { %v2994_v32 = vpop.permute.xlu0 %2993 }
 0x156   :  { %v2996_v33 = vunpack.i.h.bf16 %v2994_v32  ;;  %v2995_v34 = vunpack.i.l.bf16 %v2994_v32  ;;  %v271_v32 = vld [vmem:[%s4642_s5 + $0x70] sm:$0xff] }
 0x157   :  { %470 = vmatmul.mubr.f32.gmra.mrb[28].mxu1 %v303_v31  ;;  %v270_v31 = vld [vmem:[%s4642_s5 + $0x68] sm:$0xff] }
 0x158   :  { %v2922_v35 = vpack.c.bf16 %v2996_v33, %v2995_v34  ;;  %475 = vmatprep.mubr.f32.mxu1 %v4645_v5  ;;  %v272_v33 = vld [vmem:[%s4642_s5 + $0x78] sm:$0xff]  ;;  %v273_v34 = vld [vmem:[%s4642_s5 + $0x80] sm:$0xff] }
 0x15a   :  { %2923 = vmatprep.subr.bf16.mxu0 %v2922_v35 }
 0x15b   :  { %2925 = vmatpush3.bf16.msra.mxu0 %v2922_v35  ;;  %476 = vmatmul.mubr.f32.gmra.mrb[30].mxu1 %v304_v36  ;;  %v274_v35 = vld [vmem:[%s4642_s5 + $0x88] sm:$0xff]  ;;  %v275_v36 = vld [vmem:[%s4642_s5 + $0x90] sm:$0xff] }
 0x15c   :  { %481 = vmatprep.mubr.f32.mxu1 %v4645_v5 }
 0x15d   :  { %v2999_v38 = vpop.permute.xlu0 %2998 }
 0x15e   :  { %v3001_v39 = vunpack.i.h.bf16 %v2999_v38  ;;  %v3000_v40 = vunpack.i.l.bf16 %v2999_v38  ;;  %v277_v38 = vld [vmem:[%s4642_s5 + $0xa0] sm:$0xff] }
 0x15f   :  { %482 = vmatmul.mubr.f32.gmra.mrb[32].mxu1 %v305_v37  ;;  %v276_v37 = vld [vmem:[%s4642_s5 + $0x98] sm:$0xff] }
 0x160   :  { %v2926_v41 = vpack.c.bf16 %v3001_v39, %v3000_v40  ;;  %487 = vmatprep.mubr.f32.mxu1 %v4645_v5  ;;  %v278_v39 = vld [vmem:[%s4642_s5 + $0xa8] sm:$0xff]  ;;  %v279_v40 = vld [vmem:[%s4642_s5 + $0xb0] sm:$0xff] }
 0x162   :  { %2927 = vmatprep.subr.bf16.mxu0 %v2926_v41 }
 0x163   :  { %2929 = vmatpush3.bf16.msra.mxu0 %v2926_v41  ;;  %488 = vmatmul.mubr.f32.gmra.mrb[34].mxu1 %v306_v42  ;;  %v280_v41 = vld [vmem:[%s4642_s5 + $0xb8] sm:$0xff]  ;;  %v281_v42 = vld [vmem:[%s4642_s5 + $0xc0] sm:$0xff] }
 0x164   :  { %493 = vmatprep.mubr.f32.mxu1 %v4645_v5 }
 0x165   :  { %v3004_v44 = vpop.permute.xlu1 %3003 }
 0x166   :  { %v3006_v45 = vunpack.i.h.bf16 %v3004_v44  ;;  %v3005_v46 = vunpack.i.l.bf16 %v3004_v44  ;;  %v283_v44 = vld [vmem:[%s4642_s5 + $0xd0] sm:$0xff] }
 0x167   :  { %494 = vmatmul.mubr.f32.gmra.mrb[36].mxu1 %v307_v43  ;;  %v282_v43 = vld [vmem:[%s4642_s5 + $0xc8] sm:$0xff] }
 0x168   :  { %v2930_v47 = vpack.c.bf16 %v3006_v45, %v3005_v46  ;;  %499 = vmatprep.mubr.f32.mxu1 %v4645_v5  ;;  %v284_v45 = vld [vmem:[%s4642_s5 + $0xd8] sm:$0xff]  ;;  %v285_v46 = vld [vmem:[%s4642_s5 + $0xe0] sm:$0xff] }
 0x16a   :  { %2931 = vmatprep.subr.bf16.mxu0 %v2930_v47 }
 0x16b   :  { %2933 = vmatpush3.bf16.msra.mxu0 %v2930_v47  ;;  %500 = vmatmul.mubr.f32.gmra.mrb[38].mxu1 %v308_v48  ;;  %v286_v47 = vld [vmem:[%s4642_s5 + $0xe8] sm:$0xff]  ;;  %v287_v48 = vld [vmem:[%s4642_s5 + $0xf0] sm:$0xff] }
 0x16c   :  { %505 = vmatprep.mubr.f32.mxu1 %v4645_v5 }
 0x16d   :  { %v3009_v50 = vpop.permute.xlu1 %3008 }
 0x16e   :  { %v3011_v51 = vunpack.i.h.bf16 %v3009_v50  ;;  %v3010_v52 = vunpack.i.l.bf16 %v3009_v50  ;;  %v867_v50 = vld [vmem:[%s4641_s4] sm:$0xff] }
 0x16f   :  { %506 = vmatmul.mubr.f32.gmra.mrb[40].mxu1 %v309_v49  ;;  %v288_v49 = vld [vmem:[%s4642_s5 + $0xf8] sm:$0xff] }
 0x170   :  { %v2934_v53 = vpack.c.bf16 %v3011_v51, %v3010_v52  ;;  %511 = vmatprep.mubr.f32.mxu1 %v4645_v5  ;;  %v868_v51 = vld [vmem:[%s4641_s4 + $0x8] sm:$0xff]  ;;  %v869_v52 = vld [vmem:[%s4641_s4 + $0x10] sm:$0xff] }
 0x172   :  { %2935 = vmatprep.subr.bf16.mxu0 %v2934_v53 }
 0x173   :  { %2937 = vmatpush3.bf16.msra.mxu0 %v2934_v53  ;;  %512 = vmatmul.mubr.f32.gmra.mrb[42].mxu1 %v310_v54  ;;  %v870_v53 = vld [vmem:[%s4641_s4 + $0x18] sm:$0xff]  ;;  %v871_v54 = vld [vmem:[%s4641_s4 + $0x20] sm:$0xff] }
 0x174   :  { %517 = vmatprep.mubr.f32.mxu1 %v4645_v5 }
 0x175   :  { %v3014_v56 = vpop.permute.xlu0 %3013 }
 0x176   :  { %v3016_v57 = vunpack.i.h.bf16 %v3014_v56  ;;  %v3015_v58 = vunpack.i.l.bf16 %v3014_v56  ;;  %v873_v56 = vld [vmem:[%s4641_s4 + $0x30] sm:$0xff] }
 0x177   :  { %518 = vmatmul.mubr.f32.gmra.mrb[44].mxu1 %v311_v55  ;;  %v872_v55 = vld [vmem:[%s4641_s4 + $0x28] sm:$0xff] }
 0x178   :  { %v2938_v59 = vpack.c.bf16 %v3016_v57, %v3015_v58  ;;  %523 = vmatprep.mubr.f32.mxu1 %v4645_v5  ;;  %v874_v57 = vld [vmem:[%s4641_s4 + $0x38] sm:$0xff]  ;;  %v875_v58 = vld [vmem:[%s4641_s4 + $0x40] sm:$0xff] }
 0x17a   :  { %2939 = vmatprep.subr.bf16.mxu0 %v2938_v59 }
 0x17b   :  { %2941 = vmatpush3.bf16.msra.mxu0 %v2938_v59  ;;  %524 = vmatmul.mubr.f32.gmra.mrb[46].mxu1 %v312_v60  ;;  %v876_v59 = vld [vmem:[%s4641_s4 + $0x48] sm:$0xff]  ;;  %v877_v60 = vld [vmem:[%s4641_s4 + $0x50] sm:$0xff] }
 0x17c   :  { %529 = vmatprep.mubr.f32.mxu1 %v4645_v5 }
 0x17d   :  { %v3019_v62 = vpop.permute.xlu1 %3018 }
 0x17e   :  { %v3021_v63 = vunpack.i.h.bf16 %v3019_v62  ;;  %v3020_v0 = vunpack.i.l.bf16 %v3019_v62  ;;  %v879_v62 = vld [vmem:[%s4641_s4 + $0x60] sm:$0xff] }
 0x17f   :  { %530 = vmatmul.mubr.f32.gmra.mrb[48].mxu1 %v313_v61  ;;  %v878_v61 = vld [vmem:[%s4641_s4 + $0x58] sm:$0xff] }
 0x180   :  { %v2942_v1 = vpack.c.bf16 %v3021_v63, %v3020_v0  ;;  %535 = vmatprep.mubr.f32.mxu1 %v4645_v5  ;;  %v880_v63 = vld [vmem:[%s4641_s4 + $0x68] sm:$0xff]  ;;  %v881_v0 = vld [vmem:[%s4641_s4 + $0x70] sm:$0xff] }
 0x182   :  { %2943 = vmatprep.subr.bf16.mxu0 %v2942_v1 }
 0x183   :  { %2945 = vmatpush3.bf16.msra.mxu0 %v2942_v1  ;;  %536 = vmatmul.mubr.f32.gmra.mrb[50].mxu1 %v314_v2  ;;  %v882_v1 = vld [vmem:[%s4641_s4 + $0x78] sm:$0xff]  ;;  %v883_v2 = vld [vmem:[%s4641_s4 + $0x80] sm:$0xff] }
 0x184   :  { %541 = vmatprep.mubr.f32.mxu1 %v4645_v5 }
 0x185   :  { %v3024_v4 = vpop.permute.xlu0 %3023 }
 0x186   :  { %v3026_v6 = vunpack.i.h.bf16 %v3024_v4  ;;  %v3025_v7 = vunpack.i.l.bf16 %v3024_v4  ;;  %v884_v4 = vld [vmem:[%s4641_s4 + $0x88] sm:$0xff] }
 0x187   :  { %542 = vmatmul.mubr.f32.gmra.mrb[52].mxu1 %v315_v3 }
 0x188   :  { %v2946_v8 = vpack.c.bf16 %v3026_v6, %v3025_v7  ;;  %547 = vmatprep.mubr.f32.mxu1 %v4645_v5  ;;  %v885_v7 = vld [vmem:[%s4641_s4 + $0x90] sm:$0xff] }
 0x18a   :  { %2947 = vmatprep.subr.bf16.mxu0 %v2946_v8 }
 0x18b   :  { %2949 = vmatpush3.bf16.msra.mxu0 %v2946_v8  ;;  %548 = vmatmul.mubr.f32.gmra.mrb[54].mxu1 %v316_v9  ;;  %v886_v9 = vld [vmem:[%s4641_s4 + $0x98] sm:$0xff] }
 0x18c   :  { %553 = vmatprep.mubr.f32.mxu1 %v4645_v5 }
 0x18d   :  { %v3029_v11 = vpop.permute.xlu1 %3028 }
 0x18e   :  { %v3031_v12 = vunpack.i.h.bf16 %v3029_v11  ;;  %v3030_v13 = vunpack.i.l.bf16 %v3029_v11  ;;  %v887_v11 = vld [vmem:[%s4641_s4 + $0xa0] sm:$0xff] }
 0x18f   :  { %554 = vmatmul.mubr.f32.gmra.mrb[56].mxu1 %v317_v10 }
 0x190   :  { %v2950_v14 = vpack.c.bf16 %v3031_v12, %v3030_v13  ;;  %559 = vmatprep.mubr.f32.mxu1 %v4645_v5  ;;  %v888_v13 = vld [vmem:[%s4641_s4 + $0xa8] sm:$0xff] }
 0x192   :  { %2951 = vmatprep.subr.bf16.mxu0 %v2950_v14 }
 0x193   :  { %2953 = vmatpush3.bf16.msra.mxu0 %v2950_v14  ;;  %560 = vmatmul.mubr.f32.gmra.mrb[58].mxu1 %v318_v15  ;;  %v889_v15 = vld [vmem:[%s4641_s4 + $0xb0] sm:$0xff] }
 0x194   :  { %2836 = vmatprep.subr.mxu0 %v899_v16  ;;  %565 = vmatprep.mubr.f32.mxu1 %v4645_v5 }
 0x196   :  { %2789 = vmatmul.mubr.f32.vlgmr.msra.gmra.mrb[32].mxu0 %v258_v17  ;;  %v890_v17 = vld [vmem:[%s4641_s4 + $0xb8] sm:$0xff] }
 0x197   :  { %2791 = vmatprep.mubr.f32.mxu0 %v259_v18  ;;  %2837 = vmatpush3.msra.mxu0 %v899_v16 }
 0x198   :  { %566 = vmatmul.mubr.f32.gmra.mrb[60].mxu1 %v319_v19  ;;  %v891_v19 = vld [vmem:[%s4641_s4 + $0xc0] sm:$0xff] }
 0x199   :  { %571 = vmatprep.mubr.f32.mxu1 %v4645_v5 }
 0x19a   :  { %2792 = vmatmul.mubr.f32.gmra.mrb[34].mxu0 %v260_v20 }
 0x19b   :  { %2794 = vmatprep.mubr.f32.mxu0 %v261_v21  ;;  %v892_v21 = vld [vmem:[%s4641_s4 + $0xc8] sm:$0xff] }
 0x19c   :  { %572 = vmatmul.mubr.f32.gmra.mrb[62].mxu1 %v320_v22 }
 0x19d   :  { %1711 = vmatprep.mubr.f32.mxu1 %v4645_v5 }
 0x19e   :  { %2795 = vmatmul.mubr.f32.gmra.mrb[36].mxu0 %v262_v23  ;;  %v893_v23 = vld [vmem:[%s4641_s4 + $0xd0] sm:$0xff] }
 0x19f   :  { %2797 = vmatprep.mubr.f32.mxu0 %v263_v24 }
 0x1a2   :  { %2798 = vmatmul.mubr.f32.gmra.mrb[38].mxu0 %v264_v25  ;;  %v894_v25 = vld [vmem:[%s4641_s4 + $0xd8] sm:$0xff] }
 0x1a3   :  { %2800 = vmatprep.mubr.f32.mxu0 %v265_v26 }
 0x1a6   :  { %2801 = vmatmul.mubr.f32.gmra.mrb[40].mxu0 %v266_v27  ;;  %v895_v27 = vld [vmem:[%s4641_s4 + $0xe0] sm:$0xff] }
 0x1a7   :  { %2803 = vmatprep.mubr.f32.mxu0 %v267_v28 }
 0x1aa   :  { %2804 = vmatmul.mubr.f32.gmra.mrb[42].mxu0 %v268_v29  ;;  %v896_v29 = vld [vmem:[%s4641_s4 + $0xe8] sm:$0xff] }
 0x1ab   :  { %2806 = vmatprep.mubr.f32.mxu0 %v269_v30 }
 0x1ae   :  { %2807 = vmatmul.mubr.f32.gmra.mrb[44].mxu0 %v270_v31  ;;  %v897_v31 = vld [vmem:[%s4641_s4 + $0xf0] sm:$0xff] }
 0x1af   :  { %2809 = vmatprep.mubr.f32.mxu0 %v271_v32 }
 0x1b2   :  { %2810 = vmatmul.mubr.f32.gmra.mrb[46].mxu0 %v272_v33  ;;  %v898_v33 = vld [vmem:[%s4641_s4 + $0xf8] sm:$0xff] }
 0x1b3   :  { %2812 = vmatprep.mubr.f32.mxu0 %v273_v34 }
 0x1b6   :  { %2813 = vmatmul.mubr.f32.gmra.mrb[48].mxu0 %v274_v35 }
 0x1b7   :  { %2815 = vmatprep.mubr.f32.mxu0 %v275_v36 }
 0x1ba   :  { %2816 = vmatmul.mubr.f32.gmra.mrb[50].mxu0 %v276_v37 }
 0x1bb   :  { %2818 = vmatprep.mubr.f32.mxu0 %v277_v38 }
 0x1be   :  { %2819 = vmatmul.mubr.f32.gmra.mrb[52].mxu0 %v278_v39 }
 0x1bf   :  { %2821 = vmatprep.mubr.f32.mxu0 %v279_v40 }
 0x1c2   :  { %2822 = vmatmul.mubr.f32.gmra.mrb[54].mxu0 %v280_v41 }
 0x1c3   :  { %2824 = vmatprep.mubr.f32.mxu0 %v281_v42 }
 0x1c6   :  { %2825 = vmatmul.mubr.f32.gmra.mrb[56].mxu0 %v282_v43 }
 0x1c7   :  { %2827 = vmatprep.mubr.f32.mxu0 %v283_v44 }
 0x1ca   :  { %2828 = vmatmul.mubr.f32.gmra.mrb[58].mxu0 %v284_v45 }
 0x1cb   :  { %2830 = vmatprep.mubr.f32.mxu0 %v285_v46 }
 0x1ce   :  { %2831 = vmatmul.mubr.f32.gmra.mrb[60].mxu0 %v286_v47 }
 0x1cf   :  { %2833 = vmatprep.mubr.f32.mxu0 %v287_v48 }
 0x1d2   :  { %2834 = vmatmul.mubr.f32.gmra.mrb[62].mxu0 %v288_v49 }
 0x1d3   :  { %2838 = vmatprep.mubr.msk.f32.mxu0 %vm900_vm1, %v867_v50 }
 0x1d6   :  { %2839 = vmatmul.mubr.msk.f32.vlgmr.msra.gmra.mrb[64].mxu0 %vm900_vm1, %v868_v51 }
 0x1d7   :  { %2841 = vmatprep.mubr.msk.f32.mxu0 %vm900_vm1, %v869_v52 }
 0x1da   :  { %2842 = vmatmul.mubr.msk.f32.gmra.mrb[66].mxu0 %vm900_vm1, %v870_v53 }
 0x1db   :  { %2844 = vmatprep.mubr.msk.f32.mxu0 %vm900_vm1, %v871_v54 }
 0x1de   :  { %2845 = vmatmul.mubr.msk.f32.gmra.mrb[68].mxu0 %vm900_vm1, %v872_v55 }
 0x1df   :  { %2847 = vmatprep.mubr.msk.f32.mxu0 %vm900_vm1, %v873_v56 }
 0x1e2   :  { %2848 = vmatmul.mubr.msk.f32.gmra.mrb[70].mxu0 %vm900_vm1, %v874_v57 }
 0x1e3   :  { %2850 = vmatprep.mubr.msk.f32.mxu0 %vm900_vm1, %v875_v58 }
 0x1e6   :  { %2851 = vmatmul.mubr.msk.f32.gmra.mrb[72].mxu0 %vm900_vm1, %v876_v59 }
 0x1e7   :  { %2853 = vmatprep.mubr.msk.f32.mxu0 %vm900_vm1, %v877_v60 }
 0x1ea   :  { %2854 = vmatmul.mubr.msk.f32.gmra.mrb[74].mxu0 %vm900_vm1, %v878_v61 }
 0x1eb   :  { %2856 = vmatprep.mubr.msk.f32.mxu0 %vm900_vm1, %v879_v62 }
 0x1ee   :  { %2857 = vmatmul.mubr.msk.f32.gmra.mrb[76].mxu0 %vm900_vm1, %v880_v63 }
 0x1ef   :  { %2859 = vmatprep.mubr.msk.f32.mxu0 %vm900_vm1, %v881_v0 }
 0x1f2   :  { %2860 = vmatmul.mubr.msk.f32.gmra.mrb[78].mxu0 %vm900_vm1, %v882_v1  ;;  %v3804_v3 = vpop.f32.mrb[0].mxu1 }
 0x1f3   :  { %2862 = vmatprep.mubr.msk.f32.mxu0 %vm900_vm1, %v883_v2  ;;  %v3810_v6 = vpop.f32.mrb[1].mxu1 }
 0x1f6   :  { %2863 = vmatmul.mubr.msk.f32.gmra.mrb[80].mxu0 %vm900_vm1, %v884_v4  ;;  %v3816_v8 = vpop.f32.mrb[2].mxu1 }
 0x1f7   :  { %2865 = vmatprep.mubr.msk.f32.mxu0 %vm900_vm1, %v885_v7  ;;  %v3822_v10 = vpop.f32.mrb[3].mxu1 }
 0x1fa   :  { %2866 = vmatmul.mubr.msk.f32.gmra.mrb[82].mxu0 %vm900_vm1, %v886_v9  ;;  %v3828_v12 = vpop.f32.mrb[4].mxu1  ;;  %v1543_v9 = vld [vmem:[%s4640_s3] sm:$0xff] }
 0x1fb   :  { %2868 = vmatprep.mubr.msk.f32.mxu0 %vm900_vm1, %v887_v11  ;;  %v3834_v14 = vpop.f32.mrb[5].mxu1 }
 0x1fe   :  { %2869 = vmatmul.mubr.msk.f32.gmra.mrb[84].mxu0 %vm900_vm1, %v888_v13  ;;  %v3840_v16 = vpop.f32.mrb[6].mxu1  ;;  %v1545_v13 = vcombine.high %v1543_v9, %v1543_v9 }
 0x1ff   :  { %2871 = vmatprep.mubr.msk.f32.mxu0 %vm900_vm1, %v889_v15  ;;  %v3846_v18 = vpop.f32.mrb[7].mxu1 }
 0x200   :  { %2545 = vmatprep.subr.msk.mxu1 %vm1642_vm2, %v1545_v13 }
 0x201   :  { %2546 = vmatpush1.msk.msra.mxu1 %vm1642_vm2, %v1543_v9 }
 0x202   :  { %2872 = vmatmul.mubr.msk.f32.gmra.mrb[86].mxu0 %vm900_vm1, %v890_v17  ;;  %v3852_v20 = vpop.f32.mrb[8].mxu1 }
 0x203   :  { %2874 = vmatprep.mubr.msk.f32.mxu0 %vm900_vm1, %v891_v19  ;;  %v3858_v22 = vpop.f32.mrb[9].mxu1 }
 0x206   :  { %2875 = vmatmul.mubr.msk.f32.gmra.mrb[88].mxu0 %vm900_vm1, %v892_v21  ;;  %v3864_v24 = vpop.f32.mrb[10].mxu1 }
 0x207   :  { %2877 = vmatprep.mubr.msk.f32.mxu0 %vm900_vm1, %v893_v23  ;;  %v3870_v26 = vpop.f32.mrb[11].mxu1 }
 0x20a   :  { %2878 = vmatmul.mubr.msk.f32.gmra.mrb[90].mxu0 %vm900_vm1, %v894_v25  ;;  %v3876_v28 = vpop.f32.mrb[12].mxu1 }
 0x20b   :  { %2880 = vmatprep.mubr.msk.f32.mxu0 %vm900_vm1, %v895_v27  ;;  %v3882_v30 = vpop.f32.mrb[13].mxu1 }
 0x20e   :  { %2881 = vmatmul.mubr.msk.f32.gmra.mrb[92].mxu0 %vm900_vm1, %v896_v29  ;;  %v3888_v32 = vpop.f32.mrb[14].mxu1 }
 0x20f   :  { %2883 = vmatprep.mubr.msk.f32.mxu0 %vm900_vm1, %v897_v31  ;;  %v3894_v34 = vpop.f32.mrb[15].mxu1 }
 0x212   :  { %2884 = vmatmul.mubr.msk.f32.gmra.mrb[94].mxu0 %vm900_vm1, %v898_v33  ;;  %v3897_v35 = vpop.f32.mrb[16].mxu1 }
 0x213   :  { %v3899_v36 = vpop.f32.mrb[17].mxu1 }
 0x216   :  { %v3901_v37 = vpop.f32.mrb[18].mxu1 }
 0x217   :  { %v3903_v38 = vpop.f32.mrb[19].mxu1 }
 0x21a   :  { %v3905_v39 = vpop.f32.mrb[20].mxu1 }
 0x21b   :  { %v3907_v40 = vpop.f32.mrb[21].mxu1 }
 0x21e   :  { %v3909_v41 = vpop.f32.mrb[22].mxu1 }
 0x21f   :  { %v3911_v42 = vpop.f32.mrb[23].mxu1 }
 0x222   :  { %v3913_v43 = vpop.f32.mrb[24].mxu1 }
 0x223   :  { %v3915_v44 = vpop.f32.mrb[25].mxu1 }
 0x226   :  { %v3917_v45 = vpop.f32.mrb[26].mxu1 }
 0x227   :  { %v3919_v46 = vpop.f32.mrb[27].mxu1 }
 0x22a   :  { %v3921_v47 = vpop.f32.mrb[28].mxu1 }
 0x22b   :  { %v3923_v48 = vpop.f32.mrb[29].mxu1 }
 0x22e   :  { %v3925_v49 = vpop.f32.mrb[30].mxu1 }
 0x22f   :  { %4647 = vst [vmem:[#allocation5_spill] sm:$0xff] %v3925_v49  ;;  %v3927_v50 = vpop.f32.mrb[31].mxu1 }
 0x232   :  { %v3929_v51 = vpop.f32.mrb[32].mxu1 }
 0x233   :  { %v3931_v52 = vpop.f32.mrb[33].mxu1 }
 0x236   :  { %v3933_v53 = vpop.f32.mrb[34].mxu1 }
 0x237   :  { %v3935_v54 = vpop.f32.mrb[35].mxu1 }
 0x23a   :  { %v3937_v55 = vpop.f32.mrb[36].mxu1 }
 0x23b   :  { %4648 = vst [vmem:[#allocation6_spill] sm:$0xff] %v3937_v55  ;;  %v3939_v56 = vpop.f32.mrb[37].mxu1 }
 0x23e   :  { %v3941_v57 = vpop.f32.mrb[38].mxu1 }
 0x23f   :  { %4649 = vst [vmem:[#allocation7_spill] sm:$0xff] %v3941_v57  ;;  %v3943_v58 = vpop.f32.mrb[39].mxu1 }
 0x242   :  { %v3945_v59 = vpop.f32.mrb[40].mxu1 }
 0x243   :  { %4650 = vst [vmem:[#allocation8_spill] sm:$0xff] %v3945_v59  ;;  %v3947_v60 = vpop.f32.mrb[41].mxu1 }
 0x246   :  { %v3949_v61 = vpop.f32.mrb[42].mxu1 }
 0x247   :  { %4651 = vst [vmem:[#allocation9_spill] sm:$0xff] %v3949_v61  ;;  %v3951_v62 = vpop.f32.mrb[43].mxu1 }
 0x24a   :  { %v3953_v63 = vpop.f32.mrb[44].mxu1 }
 0x24b   :  { %4652 = vst [vmem:[#allocation10_spill] sm:$0xff] %v3953_v63  ;;  %v3955_v0 = vpop.f32.mrb[45].mxu1 }
 0x24e   :  { %v3957_v1 = vpop.f32.mrb[46].mxu1 }
 0x24f   :  { %4653 = vst [vmem:[#allocation11_spill] sm:$0xff] %v3957_v1  ;;  %v3959_v2 = vpop.f32.mrb[47].mxu1 }
 0x252   :  { %v3961_v4 = vpop.f32.mrb[48].mxu1 }
 0x253   :  { %4654 = vst [vmem:[#allocation12_spill] sm:$0xff] %v3961_v4  ;;  %v3963_v7 = vpop.f32.mrb[49].mxu1 }
 0x256   :  { %v3968_v11 = vpop.f32.mrb[50].mxu1 }
 0x257   :  { %4655 = vst [vmem:[#allocation13_spill] sm:$0xff] %v3968_v11  ;;  %v3970_v15 = vpop.f32.mrb[51].mxu1 }
 0x25a   :  { %v3972_v17 = vpop.f32.mrb[52].mxu1 }
 0x25b   :  { %4656 = vst [vmem:[#allocation14_spill] sm:$0xff] %v3972_v17  ;;  %v3974_v19 = vpop.f32.mrb[53].mxu1 }
 0x25e   :  { %v3976_v21 = vpop.f32.mrb[54].mxu1 }
 0x25f   :  { %4657 = vst [vmem:[#allocation15_spill] sm:$0xff] %v3976_v21  ;;  %v551_v23 = vpop.f32.mrb[55].mxu1 }
 0x262   :  { %v3978_v25 = vpop.f32.mrb[56].mxu1 }
 0x263   :  { %4658 = vst [vmem:[#allocation16_spill] sm:$0xff] %v3978_v25  ;;  %v3980_v27 = vpop.f32.mrb[57].mxu1 }
 0x266   :  { %v3982_v29 = vpop.f32.mrb[58].mxu1 }
 0x267   :  { %4659 = vst [vmem:[#allocation17_spill] sm:$0xff] %v3982_v29  ;;  %v563_v31 = vpop.f32.mrb[59].mxu1 }
 0x269   :  { %v2790_v33 = vpop.f32.mrb[32].mxu0 }
 0x26a   :  { %v3985_v5 = vadd.f32 %v2790_v33, %v3822_v10  ;;  %v708_v13 = vpop.f32.mrb[33].mxu0 }
 0x26b   :  { %v3988_v9 = vadd.f32 %v708_v13, %v3810_v6  ;;  %v3990_v49 = vpop.f32.mrb[60].mxu1 }
 0x26c   :  { %4660 = vst [vmem:[#allocation18_spill] sm:$0xff] %v3990_v49  ;;  %v569_v17 = vpop.f32.mrb[61].mxu1 }
 0x26d   :  { %v2793_v21 = vpop.f32.mrb[34].mxu0 }
 0x26e   :  { %v3993_v11 = vadd.f32 %v2793_v21, %v3846_v18  ;;  %v718_v25 = vpop.f32.mrb[35].mxu0 }
 0x26f   :  { %v3996_v4 = vadd.f32 %v718_v25, %v3834_v14  ;;  %v3998_v29 = vpop.f32.mrb[62].mxu1 }
 0x270   :  { %4661 = vst [vmem:[#allocation19_spill] sm:$0xff] %v3998_v29  ;;  %v575_v1 = vpop.f32.mrb[63].mxu1 }
 0x271   :  { %v2796_v10 = vpop.f32.mrb[36].mxu0 }
 0x272   :  { %v4001_v33 = vadd.f32 %v2796_v10, %v3870_v26  ;;  %v728_v6 = vpop.f32.mrb[37].mxu0 }
 0x273   :  { %v4004_v13 = vadd.f32 %v728_v6, %v3858_v22 }
 0x275   :  { %v2799_v49 = vpop.f32.mrb[38].mxu0 }
 0x276   :  { %v4007_v63 = vadd.f32 %v2799_v49, %v3894_v34  ;;  %v738_v18 = vpop.f32.mrb[39].mxu0 }
 0x277   :  { %v4010_v21 = vadd.f32 %v738_v18, %v3882_v30 }
 0x279   :  { %v2802_v14 = vpop.f32.mrb[40].mxu0 }
 0x27a   :  { %v4013_v25 = vadd.f32 %v2802_v14, %v3903_v38  ;;  %v748_v29 = vpop.f32.mrb[41].mxu0 }
 0x27b   :  { %v4016_v26 = vadd.f32 %v748_v29, %v3899_v36 }
 0x27d   :  { %v2805_v10 = vpop.f32.mrb[42].mxu0 }
 0x27e   :  { %v4019_v22 = vadd.f32 %v2805_v10, %v3911_v42  ;;  %v758_v6 = vpop.f32.mrb[43].mxu0 }
 0x27f   :  { %v4022_v34 = vadd.f32 %v758_v6, %v3907_v40 }
 0x281   :  { %v2808_v49 = vpop.f32.mrb[44].mxu0 }
 0x282   :  { %v4025_v30 = vadd.f32 %v2808_v49, %v3919_v46  ;;  %v768_v18 = vpop.f32.mrb[45].mxu0 }
 0x283   :  { %v4028_v38 = vadd.f32 %v768_v18, %v3915_v44 }
 0x285   :  { %v2811_v14 = vpop.f32.mrb[46].mxu0 }
 0x286   :  { %v4031_v36 = vadd.f32 %v2811_v14, %v3927_v50  ;;  %v778_v29 = vpop.f32.mrb[47].mxu0 }
 0x287   :  { %v4034_v42 = vadd.f32 %v778_v29, %v3923_v48 }
 0x289   :  { %v2814_v10 = vpop.f32.mrb[48].mxu0 }
 0x28a   :  { %v4037_v40 = vadd.f32 %v2814_v10, %v3935_v54  ;;  %v788_v6 = vpop.f32.mrb[49].mxu0 }
 0x28b   :  { %v4040_v46 = vadd.f32 %v788_v6, %v3931_v52 }
 0x28d   :  { %v2817_v49 = vpop.f32.mrb[50].mxu0 }
 0x28e   :  { %v4043_v44 = vadd.f32 %v2817_v49, %v3943_v58  ;;  %v798_v18 = vpop.f32.mrb[51].mxu0 }
 0x28f   :  { %v4046_v50 = vadd.f32 %v798_v18, %v3939_v56 }
 0x291   :  { %v2820_v14 = vpop.f32.mrb[52].mxu0 }
 0x292   :  { %v4049_v48 = vadd.f32 %v2820_v14, %v3951_v62  ;;  %v808_v29 = vpop.f32.mrb[53].mxu0 }
 0x293   :  { %v4052_v54 = vadd.f32 %v808_v29, %v3947_v60 }
 0x295   :  { %v2823_v10 = vpop.f32.mrb[54].mxu0 }
 0x296   :  { %v4055_v52 = vadd.f32 %v2823_v10, %v3959_v2  ;;  %v818_v6 = vpop.f32.mrb[55].mxu0 }
 0x297   :  { %v4058_v58 = vadd.f32 %v818_v6, %v3955_v0 }
 0x299   :  { %v2826_v49 = vpop.f32.mrb[56].mxu0 }
 0x29a   :  { %v4061_v56 = vadd.f32 %v2826_v49, %v3970_v15  ;;  %v828_v18 = vpop.f32.mrb[57].mxu0 }
 0x29b   :  { %v4064_v62 = vadd.f32 %v828_v18, %v3963_v7 }
 0x29d   :  { %v2829_v14 = vpop.f32.mrb[58].mxu0 }
 0x29e   :  { %v4066_v61 = vadd.f32 %v2829_v14, %v551_v23  ;;  %v838_v60 = vpop.f32.mrb[59].mxu0 }
 0x29f   :  { %v4069_v29 = vadd.f32 %v838_v60, %v3974_v19 }
 0x2a1   :  { %v2832_v2 = vpop.f32.mrb[60].mxu0 }
 0x2a2   :  { %v4071_v10 = vadd.f32 %v2832_v2, %v563_v31  ;;  %v848_v0 = vpop.f32.mrb[61].mxu0 }
 0x2a3   :  { %v4074_v6 = vadd.f32 %v848_v0, %v3980_v27 }
 0x2a5   :  { %v2835_v15 = vpop.f32.mrb[62].mxu0 }
 0x2a6   :  { %v858_v49 = vpop.f32.mrb[63].mxu0  ;;  %v4076_v59 = vadd.f32 %v2835_v15, %v575_v1 }
 0x2a7   :  { %v4078_v7 = vadd.f32 %v858_v49, %v569_v17 }
 0x2a9   :  { %v2840_v18 = vpop.f32.mrb[64].mxu0 }
 0x2aa   :  { %v1223_v23 = vadd.f32 %v2840_v18, %v3985_v5  ;;  %v1063_v14 = vpop.f32.mrb[65].mxu0 }
 0x2ab   :  { %v1222_v19 = vadd.f32 %v1063_v14, %v3988_v9 }
 0x2ac   :  { %v1287_v60 = vmul.f32 0.2, %v1223_v23  ;;  %vm1255_vm3 = vcmp.gt.f32.partialorder %v1223_v23, 0.0 }
 0x2ad   :  { %v1286_v31 = vmul.f32 0.2, %v1222_v19  ;;  %v2843_v2 = vpop.f32.mrb[66].mxu0  ;;  %vm1254_vm5 = vcmp.gt.f32.partialorder %v1222_v19, 0.0 }
 0x2ae   :  { %v1225_v27 = vadd.f32 %v2843_v2, %v3993_v11  ;;  %v1073_v0 = vpop.f32.mrb[67].mxu0  ;;  %v4083_v57 = vsel %vm1255_vm3, %v1223_v23, %v1287_v60 }
 0x2af   :  { %v1224_v1 = vadd.f32 %v1073_v0, %v3996_v4  ;;  %v1354_v17 = vsel %vm1350_vm4, %v4083_v57, -inf  ;;  %v4088_v5 = vsel %vm1254_vm5, %v1222_v19, %v1286_v31 }
 0x2b0   :  { %1355 = vmax.xlane.f32.xlu1 %v1354_v17  ;;  %v1351_v9 = vsel %vm1350_vm4, %v4088_v5, -inf  ;;  %v1289_v15 = vmul.f32 0.2, %v1225_v27  ;;  %vm1257_vm7 = vcmp.gt.f32.partialorder %v1225_v27, 0.0 }
 0x2b1   :  { %v1288_v49 = vmul.f32 0.2, %v1224_v1  ;;  %v2846_v18 = vpop.f32.mrb[68].mxu0  ;;  %1352 = vmax.xlane.f32.xlu0 %v1351_v9  ;;  %vm1256_vm6 = vcmp.gt.f32.partialorder %v1224_v1, 0.0 }
 0x2b2   :  { %v1227_v11 = vadd.f32 %v2846_v18, %v4001_v33  ;;  %v1083_v23 = vpop.f32.mrb[69].mxu0  ;;  %v4098_v0 = vsel %vm1257_vm7, %v1225_v27, %v1289_v15 }
 0x2b3   :  { %v1226_v4 = vadd.f32 %v1083_v23, %v4004_v13  ;;  %v4094_v14 = vsel %vm1256_vm6, %v1224_v1, %v1288_v49  ;;  %v1360_v13 = vsel %vm1350_vm4, %v4098_v0, -inf }
 0x2b4   :  { %v1357_v19 = vsel %vm1350_vm4, %v4094_v14, -inf  ;;  %v1291_v60 = vmul.f32 0.2, %v1227_v11  ;;  %vm1259_vm9 = vcmp.gt.f32.partialorder %v1227_v11, 0.0 }
 0x2b5   :  { %v1290_v31 = vmul.f32 0.2, %v1226_v4  ;;  %v2849_v2 = vpop.f32.mrb[70].mxu0  ;;  %1358 = vmax.xlane.f32.xlu0 %v1357_v19  ;;  %vm1258_vm8 = vcmp.gt.f32.partialorder %v1226_v4, 0.0 }
 0x2b6   :  { %v1229_v17 = vadd.f32 %v2849_v2, %v4007_v63  ;;  %v1093_v9 = vpop.f32.mrb[71].mxu0  ;;  %v4108_v27 = vsel %vm1259_vm9, %v1227_v11, %v1291_v60 }
 0x2b7   :  { %v1228_v33 = vadd.f32 %v1093_v9, %v4010_v21  ;;  %v4102_v18 = vsel %vm1258_vm8, %v1226_v4, %v1290_v31  ;;  %v1366_v31 = vsel %vm1350_vm4, %v4108_v27, -inf }
 0x2b8   :  { %v1363_v1 = vsel %vm1350_vm4, %v4102_v18, -inf  ;;  %v1293_v49 = vmul.f32 0.2, %v1229_v17  ;;  %vm1261_vm11 = vcmp.gt.f32.partialorder %v1229_v17, 0.0 }
 0x2b9   :  { %v1292_v23 = vmul.f32 0.2, %v1228_v33  ;;  %v2852_v19 = vpop.f32.mrb[72].mxu0  ;;  %1361 = vmax.xlane.f32.xlu0 %v1360_v13  ;;  %1364 = vmax.xlane.f32.xlu1 %v1363_v1  ;;  %vm1260_vm10 = vcmp.gt.f32.partialorder %v1228_v33, 0.0 }
 0x2ba   :  { %v1231_v63 = vadd.f32 %v2852_v19, %v4013_v25  ;;  %v1103_v15 = vpop.f32.mrb[73].mxu0  ;;  %v4118_v11 = vsel %vm1261_vm11, %v1229_v17, %v1293_v49 }
 0x2bb   :  { %v1230_v21 = vadd.f32 %v1103_v15, %v4016_v26  ;;  %v4112_v4 = vsel %vm1260_vm10, %v1228_v33, %v1292_v23  ;;  %v1372_v23 = vsel %vm1350_vm4, %v4118_v11, -inf }
 0x2bc   :  { %v1369_v2 = vsel %vm1350_vm4, %v4112_v4, -inf  ;;  %v1295_v9 = vmul.f32 0.2, %v1231_v63  ;;  %vm1263_vm13 = vcmp.gt.f32.partialorder %v1231_v63, 0.0 }
 0x2bd   :  { %v1294_v13 = vmul.f32 0.2, %v1230_v21  ;;  %v2855_v1 = vpop.f32.mrb[74].mxu0  ;;  %1367 = vmax.xlane.f32.xlu0 %v1366_v31  ;;  %1370 = vmax.xlane.f32.xlu1 %v1369_v2  ;;  %vm1262_vm12 = vcmp.gt.f32.partialorder %v1230_v21, 0.0 }
 0x2be   :  { %v1233_v25 = vadd.f32 %v2855_v1, %v4019_v22  ;;  %v1113_v60 = vpop.f32.mrb[75].mxu0  ;;  %v4128_v17 = vsel %vm1263_vm13, %v1231_v63, %v1295_v9 }
 0x2bf   :  { %v1232_v26 = vadd.f32 %v1113_v60, %v4022_v34  ;;  %v4122_v33 = vsel %vm1262_vm12, %v1230_v21, %v1294_v13  ;;  %v1378_v13 = vsel %vm1350_vm4, %v4128_v17, -inf }
 0x2c0   :  { %v1375_v19 = vsel %vm1350_vm4, %v4122_v33, -inf  ;;  %v1297_v15 = vmul.f32 0.2, %v1233_v25  ;;  %vm1265_vm15 = vcmp.gt.f32.partialorder %v1233_v25, 0.0 }
 0x2c1   :  { %v1296_v31 = vmul.f32 0.2, %v1232_v26  ;;  %v2858_v2 = vpop.f32.mrb[76].mxu0  ;;  %1373 = vmax.xlane.f32.xlu0 %v1372_v23  ;;  %1376 = vmax.xlane.f32.xlu1 %v1375_v19  ;;  %vm1264_vm14 = vcmp.gt.f32.partialorder %v1232_v26, 0.0 }
 0x2c2   :  { %v1235_v22 = vadd.f32 %v2858_v2, %v4025_v30  ;;  %v1123_v49 = vpop.f32.mrb[77].mxu0  ;;  %v4138_v63 = vsel %vm1265_vm15, %v1233_v25, %v1297_v15 }
 0x2c3   :  { %v1234_v34 = vadd.f32 %v1123_v49, %v4028_v38  ;;  %v4132_v21 = vsel %vm1264_vm14, %v1232_v26, %v1296_v31  ;;  %v1384_v31 = vsel %vm1350_vm4, %v4138_v63, -inf }
 0x2c4   :  { %v1381_v1 = vsel %vm1350_vm4, %v4132_v21, -inf  ;;  %v1299_v60 = vmul.f32 0.2, %v1235_v22  ;;  %vm1267_vm1 = vcmp.gt.f32.partialorder %v1235_v22, 0.0 }
 0x2c5   :  { %v1298_v23 = vmul.f32 0.2, %v1234_v34  ;;  %v2861_v19 = vpop.f32.mrb[78].mxu0  ;;  %1379 = vmax.xlane.f32.xlu0 %v1378_v13  ;;  %1382 = vmax.xlane.f32.xlu1 %v1381_v1  ;;  %vm1266_vm0 = vcmp.gt.f32.partialorder %v1234_v34, 0.0 }
 0x2c6   :  { %v1237_v30 = vadd.f32 %v2861_v19, %v4031_v36  ;;  %v1133_v9 = vpop.f32.mrb[79].mxu0  ;;  %v4148_v25 = vsel %vm1267_vm1, %v1235_v22, %v1299_v60 }
 0x2c7   :  { %v1236_v38 = vadd.f32 %v1133_v9, %v4034_v42  ;;  %v4142_v26 = vsel %vm1266_vm0, %v1234_v34, %v1298_v23  ;;  %v1390_v23 = vsel %vm1350_vm4, %v4148_v25, -inf }
 0x2c8   :  { %v1387_v2 = vsel %vm1350_vm4, %v4142_v26, -inf  ;;  %v1301_v49 = vmul.f32 0.2, %v1237_v30  ;;  %vm1269_vm3 = vcmp.gt.f32.partialorder %v1237_v30, 0.0 }
 0x2c9   :  { %v1300_v13 = vmul.f32 0.2, %v1236_v38  ;;  %v2864_v1 = vpop.f32.mrb[80].mxu0  ;;  %1385 = vmax.xlane.f32.xlu0 %v1384_v31  ;;  %1388 = vmax.xlane.f32.xlu1 %v1387_v2  ;;  %vm1268_vm2 = vcmp.gt.f32.partialorder %v1236_v38, 0.0 }
 0x2ca   :  { %v1239_v36 = vadd.f32 %v2864_v1, %v4037_v40  ;;  %v1143_v15 = vpop.f32.mrb[81].mxu0  ;;  %v4158_v22 = vsel %vm1269_vm3, %v1237_v30, %v1301_v49 }
 0x2cb   :  { %v1238_v42 = vadd.f32 %v1143_v15, %v4040_v46  ;;  %v4152_v34 = vsel %vm1268_vm2, %v1236_v38, %v1300_v13  ;;  %v1396_v13 = vsel %vm1350_vm4, %v4158_v22, -inf }
 0x2cc   :  { %v1393_v19 = vsel %vm1350_vm4, %v4152_v34, -inf  ;;  %v1303_v9 = vmul.f32 0.2, %v1239_v36  ;;  %vm1271_vm6 = vcmp.gt.f32.partialorder %v1239_v36, 0.0 }
 0x2cd   :  { %v1302_v31 = vmul.f32 0.2, %v1238_v42  ;;  %v2867_v2 = vpop.f32.mrb[82].mxu0  ;;  %1391 = vmax.xlane.f32.xlu0 %v1390_v23  ;;  %1394 = vmax.xlane.f32.xlu1 %v1393_v19  ;;  %vm1270_vm5 = vcmp.gt.f32.partialorder %v1238_v42, 0.0 }
 0x2ce   :  { %v1241_v40 = vadd.f32 %v2867_v2, %v4043_v44  ;;  %v1153_v60 = vpop.f32.mrb[83].mxu0  ;;  %v4168_v30 = vsel %vm1271_vm6, %v1239_v36, %v1303_v9 }
 0x2cf   :  { %v1240_v46 = vadd.f32 %v1153_v60, %v4046_v50  ;;  %v4162_v38 = vsel %vm1270_vm5, %v1238_v42, %v1302_v31  ;;  %v1402_v31 = vsel %vm1350_vm4, %v4168_v30, -inf }
 0x2d0   :  { %v1399_v1 = vsel %vm1350_vm4, %v4162_v38, -inf  ;;  %v1305_v15 = vmul.f32 0.2, %v1241_v40  ;;  %vm1273_vm8 = vcmp.gt.f32.partialorder %v1241_v40, 0.0 }
 0x2d1   :  { %v1304_v23 = vmul.f32 0.2, %v1240_v46  ;;  %v2870_v19 = vpop.f32.mrb[84].mxu0  ;;  %1397 = vmax.xlane.f32.xlu0 %v1396_v13  ;;  %1400 = vmax.xlane.f32.xlu1 %v1399_v1  ;;  %vm1272_vm7 = vcmp.gt.f32.partialorder %v1240_v46, 0.0 }
 0x2d2   :  { %v1243_v44 = vadd.f32 %v2870_v19, %v4049_v48  ;;  %v1163_v49 = vpop.f32.mrb[85].mxu0  ;;  %v4178_v36 = vsel %vm1273_vm8, %v1241_v40, %v1305_v15 }
 0x2d3   :  { %v1242_v50 = vadd.f32 %v1163_v49, %v4052_v54  ;;  %v4172_v42 = vsel %vm1272_vm7, %v1240_v46, %v1304_v23  ;;  %v1408_v23 = vsel %vm1350_vm4, %v4178_v36, -inf }
 0x2d4   :  { %v1405_v2 = vsel %vm1350_vm4, %v4172_v42, -inf  ;;  %v1307_v60 = vmul.f32 0.2, %v1243_v44  ;;  %vm1275_vm10 = vcmp.gt.f32.partialorder %v1243_v44, 0.0 }
 0x2d5   :  { %v1306_v13 = vmul.f32 0.2, %v1242_v50  ;;  %v2873_v1 = vpop.f32.mrb[86].mxu0  ;;  %1403 = vmax.xlane.f32.xlu0 %v1402_v31  ;;  %1406 = vmax.xlane.f32.xlu1 %v1405_v2  ;;  %vm1274_vm9 = vcmp.gt.f32.partialorder %v1242_v50, 0.0 }
 0x2d6   :  { %v1245_v48 = vadd.f32 %v2873_v1, %v4055_v52  ;;  %v1173_v9 = vpop.f32.mrb[87].mxu0  ;;  %v4188_v40 = vsel %vm1275_vm10, %v1243_v44, %v1307_v60 }
 0x2d7   :  { %v1244_v54 = vadd.f32 %v1173_v9, %v4058_v58  ;;  %v4182_v46 = vsel %vm1274_vm9, %v1242_v50, %v1306_v13  ;;  %v1414_v13 = vsel %vm1350_vm4, %v4188_v40, -inf }
 0x2d8   :  { %v1411_v19 = vsel %vm1350_vm4, %v4182_v46, -inf  ;;  %v1309_v49 = vmul.f32 0.2, %v1245_v48  ;;  %vm1277_vm12 = vcmp.gt.f32.partialorder %v1245_v48, 0.0 }
 0x2d9   :  { %v1308_v31 = vmul.f32 0.2, %v1244_v54  ;;  %v2876_v2 = vpop.f32.mrb[88].mxu0  ;;  %1409 = vmax.xlane.f32.xlu0 %v1408_v23  ;;  %1412 = vmax.xlane.f32.xlu1 %v1411_v19  ;;  %vm1276_vm11 = vcmp.gt.f32.partialorder %v1244_v54, 0.0 }
 0x2da   :  { %v1247_v52 = vadd.f32 %v2876_v2, %v4061_v56  ;;  %v1183_v15 = vpop.f32.mrb[89].mxu0  ;;  %v4198_v44 = vsel %vm1277_vm12, %v1245_v48, %v1309_v49 }
 0x2db   :  { %v1246_v58 = vadd.f32 %v1183_v15, %v4064_v62  ;;  %v4192_v50 = vsel %vm1276_vm11, %v1244_v54, %v1308_v31  ;;  %v1420_v31 = vsel %vm1350_vm4, %v4198_v44, -inf }
 0x2dc   :  { %v1417_v1 = vsel %vm1350_vm4, %v4192_v50, -inf  ;;  %v1311_v9 = vmul.f32 0.2, %v1247_v52  ;;  %vm1279_vm14 = vcmp.gt.f32.partialorder %v1247_v52, 0.0 }
 0x2dd   :  { %v1310_v23 = vmul.f32 0.2, %v1246_v58  ;;  %v2879_v19 = vpop.f32.mrb[90].mxu0  ;;  %1415 = vmax.xlane.f32.xlu0 %v1414_v13  ;;  %1418 = vmax.xlane.f32.xlu1 %v1417_v1  ;;  %vm1278_vm13 = vcmp.gt.f32.partialorder %v1246_v58, 0.0 }
 0x2de   :  { %v1249_v56 = vadd.f32 %v2879_v19, %v4066_v61  ;;  %v1193_v60 = vpop.f32.mrb[91].mxu0  ;;  %v4208_v48 = vsel %vm1279_vm14, %v1247_v52, %v1311_v9 }
 0x2df   :  { %v1248_v62 = vadd.f32 %v1193_v60, %v4069_v29  ;;  %v4202_v54 = vsel %vm1278_vm13, %v1246_v58, %v1310_v23  ;;  %v1426_v23 = vsel %vm1350_vm4, %v4208_v48, -inf }
 0x2e0   :  { %v1423_v2 = vsel %vm1350_vm4, %v4202_v54, -inf  ;;  %v1313_v15 = vmul.f32 0.2, %v1249_v56  ;;  %vm1281_vm0 = vcmp.gt.f32.partialorder %v1249_v56, 0.0 }
 0x2e1   :  { %v1312_v13 = vmul.f32 0.2, %v1248_v62  ;;  %v2882_v1 = vpop.f32.mrb[92].mxu0  ;;  %1421 = vmax.xlane.f32.xlu0 %v1420_v31  ;;  %1424 = vmax.xlane.f32.xlu1 %v1423_v2  ;;  %vm1280_vm15 = vcmp.gt.f32.partialorder %v1248_v62, 0.0 }
 0x2e2   :  { %v1251_v61 = vadd.f32 %v2882_v1, %v4071_v10  ;;  %v1203_v49 = vpop.f32.mrb[93].mxu0  ;;  %v4218_v52 = vsel %vm1281_vm0, %v1249_v56, %v1313_v15 }
 0x2e3   :  { %v1250_v29 = vadd.f32 %v1203_v49, %v4074_v6  ;;  %v4212_v58 = vsel %vm1280_vm15, %v1248_v62, %v1312_v13  ;;  %v1432_v13 = vsel %vm1350_vm4, %v4218_v52, -inf }
 0x2e4   :  { %v1429_v19 = vsel %vm1350_vm4, %v4212_v58, -inf  ;;  %v1315_v60 = vmul.f32 0.2, %v1251_v61  ;;  %vm1283_vm2 = vcmp.gt.f32.partialorder %v1251_v61, 0.0 }
 0x2e5   :  { %v1314_v31 = vmul.f32 0.2, %v1250_v29  ;;  %v2885_v2 = vpop.f32.mrb[94].mxu0  ;;  %1427 = vmax.xlane.f32.xlu0 %v1426_v23  ;;  %1430 = vmax.xlane.f32.xlu1 %v1429_v19  ;;  %vm1282_vm1 = vcmp.gt.f32.partialorder %v1250_v29, 0.0 }
 0x2e6   :  { %v1253_v10 = vadd.f32 %v2885_v2, %v4076_v59  ;;  %v1213_v9 = vpop.f32.mrb[95].mxu0  ;;  %v4228_v56 = vsel %vm1283_vm2, %v1251_v61, %v1315_v60 }
 0x2e7   :  { %v1252_v6 = vadd.f32 %v1213_v9, %v4078_v7  ;;  %v4222_v62 = vsel %vm1282_vm1, %v1250_v29, %v1314_v31  ;;  %v1438_v7 = vsel %vm1350_vm4, %v4228_v56, -inf }
 0x2e8   :  { %v1435_v1 = vsel %vm1350_vm4, %v4222_v62, -inf  ;;  %v1317_v49 = vmul.f32 0.2, %v1253_v10  ;;  %vm1285_vm5 = vcmp.gt.f32.partialorder %v1253_v10, 0.0 }
 0x2e9   :  { %v1316_v23 = vmul.f32 0.2, %v1252_v6  ;;  %1433 = vmax.xlane.f32.xlu0 %v1432_v13  ;;  %1436 = vmax.xlane.f32.xlu1 %v1435_v1  ;;  %vm1284_vm3 = vcmp.gt.f32.partialorder %v1252_v6, 0.0 }
 0x2ea   :  { %v4236_v29 = vsel %vm1285_vm5, %v1253_v10, %v1317_v49 }
 0x2eb   :  { %v4230_v59 = vsel %vm1284_vm3, %v1252_v6, %v1316_v23  ;;  %v1444_v19 = vsel %vm1350_vm4, %v4236_v29, -inf }
 0x2ec   :  { %v1441_v15 = vsel %vm1350_vm4, %v4230_v59, -inf }
 0x2ed   :  { %1439 = vmax.xlane.f32.xlu0 %v1438_v7  ;;  %1442 = vmax.xlane.f32.xlu1 %v1441_v15 }
 0x2f1   :  { %1445 = vmax.xlane.f32.xlu0 %v1444_v19 }
 0x33d   :  { %v1356_v61 = vpop.xlane.xlu1 %1355 }
 0x33e   :  { %v1353_v60 = vpop.xlane.xlu0 %1352  ;;  %v1448_v31 = vsub.f32 %v4083_v57, %v1356_v61 }
 0x33f   :  { %v1447_v2 = vsub.f32 %v4088_v5, %v1353_v60  ;;  %v4662_v60 = vmov 0.0  }
 0x340   :  { %v1481_v13 = vmul.f32 1.442695, %v1448_v31 }
 0x341   :  { %v1479_v9 = vmul.f32 1.442695, %v1447_v2 }
 0x342   :  { %v1359_v6 = vpop.xlane.xlu0 %1358 }
 0x343   :  { %3147 = vpow2.f32 %v1479_v9  ;;  %v1449_v1 = vsub.f32 %v4094_v14, %v1359_v6 }
 0x344   :  { %3149 = vpow2.f32 %v1481_v13 }
 0x345   :  { %v1483_v10 = vmul.f32 1.442695, %v1449_v1 }
 0x346   :  { %v1362_v23 = vpop.xlane.xlu0 %1361  ;;  %v1365_v7 = vpop.xlane.xlu1 %1364 }
 0x347   :  { %v1450_v49 = vsub.f32 %v4098_v0, %v1362_v23  ;;  %3151 = vpow2.f32 %v1483_v10  ;;  %v1451_v19 = vsub.f32 %v4102_v18, %v1365_v7 }
 0x349   :  { %v1485_v15 = vmul.f32 1.442695, %v1450_v49  ;;  %v1487_v5 = vmul.f32 1.442695, %v1451_v19 }
 0x34a   :  { %v1368_v55 = vpop.xlane.xlu0 %1367  ;;  %v1371_v14 = vpop.xlane.xlu1 %1370 }
 0x34b   :  { %3153 = vpow2.f32 %v1485_v15  ;;  %v1452_v61 = vsub.f32 %v4108_v27, %v1368_v55  ;;  %v1453_v2 = vsub.f32 %v4112_v4, %v1371_v14 }
 0x34c   :  { %3155 = vpow2.f32 %v1487_v5 }
 0x34d   :  { %v3148_v57 = vpop.eup %3147  ;;  %v1489_v0 = vmul.f32 1.442695, %v1452_v61  ;;  %v1491_v6 = vmul.f32 1.442695, %v1453_v2 }
 0x34e   :  { %2547 = vmatmul.mubr.msk.f32.vlgmr.msra.gmra.mrb[64].mxu1 %vm1350_vm4, %v3148_v57  ;;  %v3150_v31 = vpop.eup %3149  ;;  %v1374_v18 = vpop.xlane.xlu0 %1373 }
 0x34f   :  { %1717 = vmatprep.mubr.f32.mxu1 %v4662_v60  ;;  %3157 = vpow2.f32 %v1489_v0  ;;  %v1454_v55 = vsub.f32 %v4118_v11, %v1374_v18  ;;  %v1377_v27 = vpop.xlane.xlu1 %1376 }
 0x350   :  { %3159 = vpow2.f32 %v1491_v6  ;;  %v1455_v4 = vsub.f32 %v4122_v33, %v1377_v27 }
 0x351   :  { %v3152_v9 = vpop.eup %3151  ;;  %v1493_v1 = vmul.f32 1.442695, %v1454_v55 }
 0x352   :  { %2548 = vmatmul.mubr.msk.f32.gmra.mrb[66].mxu1 %vm1350_vm4, %v3150_v31  ;;  %v1380_v23 = vpop.xlane.xlu0 %1379  ;;  %v1495_v49 = vmul.f32 1.442695, %v1455_v4 }
 0x353   :  { %1723 = vmatprep.mubr.f32.mxu1 %v4662_v60  ;;  %3161 = vpow2.f32 %v1493_v1  ;;  %v1456_v11 = vsub.f32 %v4128_v17, %v1380_v23  ;;  %v1383_v7 = vpop.xlane.xlu1 %1382 }
 0x354   :  { %3163 = vpow2.f32 %v1495_v49  ;;  %v1457_v33 = vsub.f32 %v4132_v21, %v1383_v7 }
 0x355   :  { %v3154_v13 = vpop.eup %3153  ;;  %v1497_v19 = vmul.f32 1.442695, %v1456_v11 }
 0x356   :  { %2549 = vmatmul.mubr.msk.f32.gmra.mrb[68].mxu1 %vm1350_vm4, %v3152_v9  ;;  %v3156_v10 = vpop.eup %3155  ;;  %v1386_v57 = vpop.xlane.xlu0 %1385  ;;  %v1499_v61 = vmul.f32 1.442695, %v1457_v33 }
 0x357   :  { %1729 = vmatprep.mubr.f32.mxu1 %v4662_v60  ;;  %3165 = vpow2.f32 %v1497_v19  ;;  %v1458_v17 = vsub.f32 %v4138_v63, %v1386_v57  ;;  %v1389_v14 = vpop.xlane.xlu1 %1388 }
 0x358   :  { %3167 = vpow2.f32 %v1499_v61  ;;  %v1459_v21 = vsub.f32 %v4142_v26, %v1389_v14 }
 0x359   :  { %v3158_v15 = vpop.eup %3157  ;;  %v1501_v0 = vmul.f32 1.442695, %v1458_v17 }
 0x35a   :  { %2550 = vmatmul.mubr.msk.f32.gmra.mrb[70].mxu1 %vm1350_vm4, %v3154_v13  ;;  %v3160_v5 = vpop.eup %3159  ;;  %v1392_v2 = vpop.xlane.xlu0 %1391  ;;  %v1503_v9 = vmul.f32 1.442695, %v1459_v21 }
 0x35b   :  { %1735 = vmatprep.mubr.f32.mxu1 %v4662_v60  ;;  %3169 = vpow2.f32 %v1501_v0  ;;  %v1460_v63 = vsub.f32 %v4148_v25, %v1392_v2  ;;  %v1395_v6 = vpop.xlane.xlu1 %1394 }
 0x35c   :  { %3171 = vpow2.f32 %v1503_v9  ;;  %v1461_v26 = vsub.f32 %v4152_v34, %v1395_v6 }
 0x35d   :  { %v3162_v31 = vpop.eup %3161  ;;  %v1505_v27 = vmul.f32 1.442695, %v1460_v63 }
 0x35e   :  { %2551 = vmatmul.mubr.msk.f32.gmra.mrb[72].mxu1 %vm1350_vm4, %v3156_v10  ;;  %v3164_v18 = vpop.eup %3163  ;;  %v1398_v13 = vpop.xlane.xlu0 %1397  ;;  %v1507_v4 = vmul.f32 1.442695, %v1461_v26 }
 0x35f   :  { %1741 = vmatprep.mubr.f32.mxu1 %v4662_v60  ;;  %3173 = vpow2.f32 %v1505_v27  ;;  %v1462_v25 = vsub.f32 %v4158_v22, %v1398_v13  ;;  %v1401_v23 = vpop.xlane.xlu1 %1400 }
 0x360   :  { %3175 = vpow2.f32 %v1507_v4  ;;  %v1463_v34 = vsub.f32 %v4162_v38, %v1401_v23 }
 0x361   :  { %v3166_v55 = vpop.eup %3165  ;;  %v1509_v49 = vmul.f32 1.442695, %v1462_v25 }
 0x362   :  { %2552 = vmatmul.mubr.msk.f32.gmra.mrb[74].mxu1 %vm1350_vm4, %v3158_v15  ;;  %v3168_v1 = vpop.eup %3167  ;;  %v1404_v11 = vpop.xlane.xlu0 %1403  ;;  %v1511_v15 = vmul.f32 1.442695, %v1463_v34 }
 0x363   :  { %1747 = vmatprep.mubr.f32.mxu1 %v4662_v60  ;;  %3177 = vpow2.f32 %v1509_v49  ;;  %v1464_v22 = vsub.f32 %v4168_v30, %v1404_v11  ;;  %v1407_v19 = vpop.xlane.xlu1 %1406  ;;  %v3365_v11 = vmov 0  }
 0x364   :  { %3179 = vpow2.f32 %v1511_v15  ;;  %v1465_v38 = vsub.f32 %v4172_v42, %v1407_v19  ;;  %3032 = vset.pattern.permute.xlu1 %v3365_v11  ;;  %3033 = vset.pattern.permute.xlu0 %v3365_v11 }
 0x365   :  { %v3170_v10 = vpop.eup %3169  ;;  %v1513_v57 = vmul.f32 1.442695, %v1464_v22 }
 0x366   :  { %2553 = vmatmul.mubr.msk.f32.gmra.mrb[76].mxu1 %vm1350_vm4, %v3160_v5  ;;  %v3172_v7 = vpop.eup %3171  ;;  %v1410_v5 = vpop.xlane.xlu0 %1409  ;;  %v1515_v17 = vmul.f32 1.442695, %v1465_v38 }
 0x367   :  { %1753 = vmatprep.mubr.f32.mxu1 %v4662_v60  ;;  %3181 = vpow2.f32 %v1513_v57  ;;  %v1466_v30 = vsub.f32 %v4178_v36, %v1410_v5  ;;  %v1413_v14 = vpop.xlane.xlu1 %1412 }
 0x368   :  { %3183 = vpow2.f32 %v1515_v17  ;;  %v1467_v42 = vsub.f32 %v4182_v46, %v1413_v14 }
 0x369   :  { %v3174_v33 = vpop.eup %3173  ;;  %v1517_v0 = vmul.f32 1.442695, %v1466_v30 }
 0x36a   :  { %2554 = vmatmul.mubr.msk.f32.gmra.mrb[78].mxu1 %vm1350_vm4, %v3162_v31  ;;  %v3176_v61 = vpop.eup %3175  ;;  %v1416_v21 = vpop.xlane.xlu0 %1415 }
 0x36b   :  { %1759 = vmatprep.mubr.f32.mxu1 %v4662_v60  ;;  %3185 = vpow2.f32 %v1517_v0  ;;  %v1468_v36 = vsub.f32 %v4188_v40, %v1416_v21  ;;  %v1419_v9 = vpop.xlane.xlu1 %1418 }
 0x36c   :  { %v1469_v46 = vsub.f32 %v4192_v50, %v1419_v9 }
 0x36d   :  { %v3178_v31 = vpop.eup %3177  ;;  %v1521_v6 = vmul.f32 1.442695, %v1468_v36 }
 0x36e   :  { %2555 = vmatmul.mubr.msk.f32.gmra.mrb[80].mxu1 %vm1350_vm4, %v3164_v18  ;;  %v3180_v2 = vpop.eup %3179  ;;  %v1519_v18 = vmul.f32 1.442695, %v1467_v42  ;;  %v1523_v26 = vmul.f32 1.442695, %v1469_v46 }
 0x36f   :  { %1765 = vmatprep.mubr.f32.mxu1 %v4662_v60  ;;  %v1425_v13 = vpop.xlane.xlu1 %1424 }
 0x370   :  { %3187 = vpow2.f32 %v1519_v18  ;;  %v1471_v50 = vsub.f32 %v4202_v54, %v1425_v13 }
 0x371   :  { %v3182_v63 = vpop.eup %3181  ;;  %3189 = vpow2.f32 %v1521_v6 }
 0x372   :  { %2556 = vmatmul.mubr.msk.f32.gmra.mrb[82].mxu1 %vm1350_vm4, %v3166_v55  ;;  %v1422_v55 = vpop.xlane.xlu0 %1421  ;;  %v3184_v27 = vpop.eup %3183  ;;  %3191 = vpow2.f32 %v1523_v26 }
 0x373   :  { %1771 = vmatprep.mubr.f32.mxu1 %v4662_v60  ;;  %v1470_v40 = vsub.f32 %v4198_v44, %v1422_v55  ;;  %v1431_v49 = vpop.xlane.xlu1 %1430 }
 0x375   :  { %v1525_v4 = vmul.f32 1.442695, %v1470_v40 }
 0x376   :  { %2557 = vmatmul.mubr.msk.f32.gmra.mrb[84].mxu1 %vm1350_vm4, %v3168_v1  ;;  %v3186_v1 = vpop.eup %3185  ;;  %v1428_v25 = vpop.xlane.xlu0 %1427 }
 0x377   :  { %1777 = vmatprep.mubr.f32.mxu1 %v4662_v60  ;;  %3193 = vpow2.f32 %v1525_v4  ;;  %v1472_v44 = vsub.f32 %v4208_v48, %v1428_v25 }
 0x379   :  { %v1529_v54 = vmul.f32 1.442695, %v1472_v44 }
 0x37a   :  { %2558 = vmatmul.mubr.msk.f32.gmra.mrb[86].mxu1 %vm1350_vm4, %v3170_v10  ;;  %v3188_v23 = vpop.eup %3187  ;;  %v1527_v10 = vmul.f32 1.442695, %v1471_v50  ;;  %v1434_v15 = vpop.xlane.xlu0 %1433 }
 0x37b   :  { %1783 = vmatprep.mubr.f32.mxu1 %v4662_v60  ;;  %v3190_v34 = vpop.eup %3189  ;;  %v1474_v19 = vsub.f32 %v4218_v52, %v1434_v15 }
 0x37c   :  { %3195 = vpow2.f32 %v1527_v10  ;;  %v3192_v22 = vpop.eup %3191 }
 0x37d   :  { %3197 = vpow2.f32 %v1529_v54  ;;  %v1533_v38 = vmul.f32 1.442695, %v1474_v19 }
 0x37e   :  { %2559 = vmatmul.mubr.msk.f32.gmra.mrb[88].mxu1 %vm1350_vm4, %v3172_v7  ;;  %v1473_v7 = vsub.f32 %v4212_v58, %v1431_v49  ;;  %v1440_v5 = vpop.xlane.xlu0 %1439 }
 0x37f   :  { %1789 = vmatprep.mubr.f32.mxu1 %v4662_v60  ;;  %v1476_v52 = vsub.f32 %v4228_v56, %v1440_v5 }
 0x380   :  { %v1531_v48 = vmul.f32 1.442695, %v1473_v7 }
 0x381   :  { %v3194_v57 = vpop.eup %3193 }
 0x382   :  { %2560 = vmatmul.mubr.msk.f32.gmra.mrb[90].mxu1 %vm1350_vm4, %v3174_v33  ;;  %v1437_v33 = vpop.xlane.xlu1 %1436  ;;  %3199 = vpow2.f32 %v1531_v48  ;;  %v1446_v0 = vpop.xlane.xlu0 %1445 }
 0x383   :  { %1795 = vmatprep.mubr.f32.mxu1 %v4662_v60  ;;  %v1475_v58 = vsub.f32 %v4222_v62, %v1437_v33  ;;  %3201 = vpow2.f32 %v1533_v38  ;;  %v1478_v56 = vsub.f32 %v4236_v29, %v1446_v0 }
 0x385   :  { %v1535_v17 = vmul.f32 1.442695, %v1475_v58  ;;  %v1541_v18 = vmul.f32 1.442695, %v1478_v56 }
 0x386   :  { %2561 = vmatmul.mubr.msk.f32.gmra.mrb[92].mxu1 %vm1350_vm4, %v3176_v61  ;;  %v3196_v61 = vpop.eup %3195  ;;  %v1443_v30 = vpop.xlane.xlu1 %1442 }
 0x387   :  { %1801 = vmatprep.mubr.f32.mxu1 %v4662_v60  ;;  %v3198_v14 = vpop.eup %3197  ;;  %3203 = vpow2.f32 %v1535_v17  ;;  %v1477_v62 = vsub.f32 %v4230_v59, %v1443_v30 }
 0x389   :  { %v1539_v21 = vmul.f32 1.442695, %v1477_v62 }
 0x38a   :  { %2562 = vmatmul.mubr.msk.f32.gmra.mrb[94].mxu1 %vm1350_vm4, %v3178_v31  ;;  %v1537_v31 = vmul.f32 1.442695, %v1476_v52 }
 0x38b   :  { %1807 = vmatprep.mubr.f32.mxu1 %v4662_v60 }
 0x38c   :  { %v3200_v42 = vpop.eup %3199  ;;  %3205 = vpow2.f32 %v1537_v31 }
 0x38d   :  { %3207 = vpow2.f32 %v1539_v21 }
 0x38e   :  { %2563 = vmatmul.mubr.msk.f32.gmra.mrb[96].mxu1 %vm1350_vm4, %v3180_v2  ;;  %v3202_v2 = vpop.eup %3201  ;;  %3209 = vpow2.f32 %v1541_v18 }
 0x38f   :  { %1813 = vmatprep.mubr.f32.mxu1 %v4662_v60 }
 0x391   :  { %v3204_v59 = vpop.eup %3203 }
 0x392   :  { %2564 = vmatmul.mubr.msk.f32.gmra.mrb[98].mxu1 %vm1350_vm4, %v3182_v63 }
 0x393   :  { %1819 = vmatprep.mubr.f32.mxu1 %v4662_v60 }
 0x396   :  { %2565 = vmatmul.mubr.msk.f32.gmra.mrb[100].mxu1 %vm1350_vm4, %v3184_v27  ;;  %v3206_v36 = vpop.eup %3205 }
 0x397   :  { %1825 = vmatprep.mubr.f32.mxu1 %v4662_v60  ;;  %v3208_v29 = vpop.eup %3207 }
 0x398   :  { %v3210_v9 = vpop.eup %3209 }
 0x39a   :  { %2566 = vmatmul.mubr.msk.f32.gmra.mrb[102].mxu1 %vm1350_vm4, %v3186_v1 }
 0x39b   :  { %1831 = vmatprep.mubr.f32.mxu1 %v4662_v60 }
 0x39e   :  { %2567 = vmatmul.mubr.msk.f32.gmra.mrb[104].mxu1 %vm1350_vm4, %v3188_v23 }
 0x39f   :  { %1837 = vmatprep.mubr.f32.mxu1 %v4662_v60 }
 0x3a2   :  { %2568 = vmatmul.mubr.msk.f32.gmra.mrb[106].mxu1 %vm1350_vm4, %v3190_v34 }
 0x3a3   :  { %1843 = vmatprep.mubr.f32.mxu1 %v4662_v60 }
 0x3a6   :  { %2569 = vmatmul.mubr.msk.f32.gmra.mrb[108].mxu1 %vm1350_vm4, %v3192_v22 }
 0x3a7   :  { %1849 = vmatprep.mubr.f32.mxu1 %v4662_v60 }
 0x3aa   :  { %2570 = vmatmul.mubr.msk.f32.gmra.mrb[110].mxu1 %vm1350_vm4, %v3194_v57 }
 0x3ab   :  { %1855 = vmatprep.mubr.f32.mxu1 %v4662_v60 }
 0x3ae   :  { %2571 = vmatmul.mubr.msk.f32.gmra.mrb[112].mxu1 %vm1350_vm4, %v3196_v61 }
 0x3af   :  { %1861 = vmatprep.mubr.f32.mxu1 %v4662_v60 }
 0x3b2   :  { %2572 = vmatmul.mubr.msk.f32.gmra.mrb[114].mxu1 %vm1350_vm4, %v3198_v14 }
 0x3b3   :  { %1867 = vmatprep.mubr.f32.mxu1 %v4662_v60 }
 0x3b6   :  { %2573 = vmatmul.mubr.msk.f32.gmra.mrb[116].mxu1 %vm1350_vm4, %v3200_v42 }
 0x3b7   :  { %1873 = vmatprep.mubr.f32.mxu1 %v4662_v60 }
 0x3ba   :  { %2574 = vmatmul.mubr.msk.f32.gmra.mrb[118].mxu1 %vm1350_vm4, %v3202_v2 }
 0x3bb   :  { %1879 = vmatprep.mubr.f32.mxu1 %v4662_v60 }
 0x3be   :  { %2575 = vmatmul.mubr.msk.f32.gmra.mrb[120].mxu1 %vm1350_vm4, %v3204_v59 }
 0x3bf   :  { %1885 = vmatprep.mubr.f32.mxu1 %v4662_v60 }
 0x3c2   :  { %2576 = vmatmul.mubr.msk.f32.gmra.mrb[122].mxu1 %vm1350_vm4, %v3206_v36 }
 0x3c3   :  { %1891 = vmatprep.mubr.f32.mxu1 %v4662_v60 }
 0x3c6   :  { %2577 = vmatmul.mubr.msk.f32.gmra.mrb[124].mxu1 %vm1350_vm4, %v3208_v29 }
 0x3c7   :  { %1897 = vmatprep.mubr.f32.mxu1 %v4662_v60 }
 0x3ca   :  { %2578 = vmatmul.mubr.msk.f32.gmra.mrb[126].mxu1 %vm1350_vm4, %v3210_v9 }
 0x421   :  { %v4335_v63 = vpop.f32.mrb[64].mxu1 }
 0x422   :  { %v1715_v6 = vpop.f32.mrb[65].mxu1 }
 0x423   :  { %1906 = vperm.xlu1 %3032, %v1715_v6  }
 0x425   :  { %v4337_v46 = vpop.f32.mrb[66].mxu1 }
 0x426   :  { %v1721_v55 = vpop.f32.mrb[67].mxu1 }
 0x427   :  { %1911 = vperm.xlu1 %3032, %v1721_v55  }
 0x429   :  { %v4339_v27 = vpop.f32.mrb[68].mxu1 }
 0x42a   :  { %v1727_v26 = vpop.f32.mrb[69].mxu1 }
 0x42b   :  { %1916 = vperm.xlu1 %3032, %v1727_v26  }
 0x42d   :  { %v4341_v40 = vpop.f32.mrb[70].mxu1 }
 0x42e   :  { %v1733_v13 = vpop.f32.mrb[71].mxu1 }
 0x42f   :  { %1921 = vperm.xlu1 %3032, %v1733_v13  }
 0x431   :  { %v4343_v60 = vpop.f32.mrb[72].mxu1 }
 0x432   :  { %v1739_v1 = vpop.f32.mrb[73].mxu1 }
 0x433   :  { %1926 = vperm.xlu0 %3033, %v1739_v1  }
 0x435   :  { %v4345_v4 = vpop.f32.mrb[74].mxu1 }
 0x436   :  { %v1745_v50 = vpop.f32.mrb[75].mxu1 }
 0x437   :  { %1931 = vperm.xlu1 %3032, %v1745_v50  }
 0x439   :  { %v4347_v25 = vpop.f32.mrb[76].mxu1 }
 0x43a   :  { %v1751_v23 = vpop.f32.mrb[77].mxu1 }
 0x43b   :  { %1936 = vperm.xlu0 %3033, %v1751_v23  }
 0x43d   :  { %v4349_v10 = vpop.f32.mrb[78].mxu1 }
 0x43e   :  { %v1757_v44 = vpop.f32.mrb[79].mxu1 }
 0x43f   :  { %1941 = vperm.xlu1 %3032, %v1757_v44  }
 0x441   :  { %v4351_v49 = vpop.f32.mrb[80].mxu1 }
 0x442   :  { %v1763_v34 = vpop.f32.mrb[81].mxu1 }
 0x443   :  { %1946 = vperm.xlu0 %3033, %v1763_v34  }
 0x445   :  { %v4353_v11 = vpop.f32.mrb[82].mxu1 }
 0x446   :  { %v1769_v54 = vpop.f32.mrb[83].mxu1 }
 0x447   :  { %1951 = vperm.xlu1 %3032, %v1769_v54  }
 0x449   :  { %v4355_v7 = vpop.f32.mrb[84].mxu1 }
 0x44a   :  { %v1775_v15 = vpop.f32.mrb[85].mxu1 }
 0x44b   :  { %1956 = vperm.xlu0 %3033, %v1775_v15  }
 0x44d   :  { %v4357_v22 = vpop.f32.mrb[86].mxu1 }
 0x44e   :  { %v1781_v48 = vpop.f32.mrb[87].mxu1 }
 0x44f   :  { %1961 = vperm.xlu1 %3032, %v1781_v48  }
 0x451   :  { %v4359_v19 = vpop.f32.mrb[88].mxu1 }
 0x452   :  { %v1787_v33 = vpop.f32.mrb[89].mxu1 }
 0x453   :  { %1966 = vperm.xlu0 %3033, %v1787_v33  }
 0x455   :  { %v4361_v57 = vpop.f32.mrb[90].mxu1 }
 0x456   :  { %v1793_v38 = vpop.f32.mrb[91].mxu1 }
 0x457   :  { %1971 = vperm.xlu1 %3032, %v1793_v38  }
 0x459   :  { %v4363_v58 = vpop.f32.mrb[92].mxu1 }
 0x45a   :  { %v1799_v5 = vpop.f32.mrb[93].mxu1 }
 0x45b   :  { %1976 = vperm.xlu0 %3033, %v1799_v5  }
 0x45d   :  { %v4365_v61 = vpop.f32.mrb[94].mxu1 }
 0x45e   :  { %v1805_v17 = vpop.f32.mrb[95].mxu1 }
 0x461   :  { %v4367_v52 = vpop.f32.mrb[96].mxu1 }
 0x462   :  { %v1811_v30 = vpop.f32.mrb[97].mxu1 }
 0x463   :  { %1986 = vperm.xlu1 %3032, %v1811_v30  }
 0x465   :  { %v4369_v14 = vpop.f32.mrb[98].mxu1 }
 0x466   :  { %v1817_v31 = vpop.f32.mrb[99].mxu1 }
 0x467   :  { %1991 = vperm.xlu0 %3033, %v1817_v31  }
 0x469   :  { %v4371_v62 = vpop.f32.mrb[100].mxu1 }
 0x46a   :  { %v1823_v0 = vpop.f32.mrb[101].mxu1 }
 0x46b   :  { %1996 = vperm.xlu1 %3032, %v1823_v0  }
 0x46d   :  { %v4373_v42 = vpop.f32.mrb[102].mxu1 }
 0x46e   :  { %v1829_v21 = vpop.f32.mrb[103].mxu1 }
 0x46f   :  { %2001 = vperm.xlu1 %3032, %v1829_v21  }
 0x471   :  { %v4375_v56 = vpop.f32.mrb[104].mxu1 }
 0x472   :  { %v1835_v2 = vpop.f32.mrb[105].mxu1 }
 0x473   :  { %2006 = vperm.xlu1 %3032, %v1835_v2  }
 0x475   :  { %v4377_v18 = vpop.f32.mrb[106].mxu1 }
 0x476   :  { %v1841_v59 = vpop.f32.mrb[107].mxu1 }
 0x477   :  { %2011 = vperm.xlu1 %3032, %v1841_v59  }
 0x479   :  { %v4379_v36 = vpop.f32.mrb[108].mxu1 }
 0x47a   :  { %v1847_v29 = vpop.f32.mrb[109].mxu1 }
 0x47b   :  { %2016 = vperm.xlu0 %3033, %v1847_v29  }
 0x47d   :  { %v4381_v9 = vpop.f32.mrb[110].mxu1 }
 0x47e   :  { %v1853_v6 = vpop.f32.mrb[111].mxu1 }
 0x47f   :  { %2021 = vperm.xlu1 %3032, %v1853_v6  }
 0x481   :  { %v4383_v55 = vpop.f32.mrb[112].mxu1 }
 0x482   :  { %v1859_v26 = vpop.f32.mrb[113].mxu1 }
 0x483   :  { %2026 = vperm.xlu0 %3033, %v1859_v26  }
 0x485   :  { %v4385_v13 = vpop.f32.mrb[114].mxu1 }
 0x486   :  { %v1865_v1 = vpop.f32.mrb[115].mxu1 }
 0x487   :  { %2031 = vperm.xlu1 %3032, %v1865_v1  }
 0x489   :  { %v4387_v50 = vpop.f32.mrb[116].mxu1 }
 0x48a   :  { %v1871_v23 = vpop.f32.mrb[117].mxu1 }
 0x48b   :  { %2036 = vperm.xlu0 %3033, %v1871_v23  }
 0x48d   :  { %v4389_v44 = vpop.f32.mrb[118].mxu1 }
 0x48e   :  { %v1877_v34 = vpop.f32.mrb[119].mxu1 }
 0x48f   :  { %2041 = vperm.xlu1 %3032, %v1877_v34  }
 0x491   :  { %v4391_v54 = vpop.f32.mrb[120].mxu1 }
 0x492   :  { %v1883_v15 = vpop.f32.mrb[121].mxu1 }
 0x493   :  { %2046 = vperm.xlu0 %3033, %v1883_v15  }
 0x495   :  { %v4393_v48 = vpop.f32.mrb[122].mxu1 }
 0x496   :  { %v1889_v33 = vpop.f32.mrb[123].mxu1 }
 0x497   :  { %2051 = vperm.xlu1 %3032, %v1889_v33   ;;  %v3307_v33 = vld [vmem:[%s4642_s5] sm:$0xff] }
 0x499   :  { %v4395_v38 = vpop.f32.mrb[124].mxu1 }
 0x49a   :  { %v1895_v5 = vpop.f32.mrb[125].mxu1 }
 0x49b   :  { %2056 = vperm.xlu0 %3033, %v1895_v5  }
 0x49d   :  { %v4397_v30 = vpop.f32.mrb[126].mxu1 }
 0x49e   :  { %v1901_v31 = vpop.f32.mrb[127].mxu1 }
 0x49f   :  { %2061 = vperm.xlu1 %3032, %v1901_v31  }
 0x4a2   :  { %v1907_v0 = vpop.permute.xlu1 %1906 }
 0x4a3   :  { %3211 = vrcp.f32 %v1907_v0  ;;  %1981 = vperm.xlu1 %3032, %v1805_v17  }
 0x4a6   :  { %v1912_v21 = vpop.permute.xlu1 %1911 }
 0x4a7   :  { %3213 = vrcp.f32 %v1912_v21  ;;  %v3309_v21 = vld [vmem:[%s4642_s5 + $0x8] sm:$0xff] }
 0x4aa   :  { %v1917_v2 = vpop.permute.xlu1 %1916 }
 0x4ab   :  { %3215 = vrcp.f32 %v1917_v2  ;;  %v3310_v2 = vld [vmem:[%s4642_s5 + $0x88] sm:$0xff] }
 0x4ad   :  { %v3212_v59 = vpop.eup %3211 }
 0x4ae   :  { %v1922_v29 = vpop.permute.xlu1 %1921  ;;  %v2065_v6 = vmul.f32 %v3212_v59, %v4335_v63  ;;  %v3308_v63 = vld [vmem:[%s4642_s5 + $0x80] sm:$0xff]  ;;  %v3036_v59 = vpack.i.bf16 %v3309_v21, %v3310_v2 }
 0x4af   :  { %3217 = vrcp.f32 %v1922_v29  ;;  %v3034_v5 = vpack.i.bf16 %v3307_v33, %v3308_v63  ;;  %v3315_v2 = vld [vmem:[%s4642_s5 + $0x20] sm:$0xff] }
 0x4b0   :  { %v4401_v26 = vmul.f32 %v2065_v6, %v3804_v3 }
 0x4b1   :  { %v3214_v1 = vpop.eup %3213 }
 0x4b2   :  { %v1927_v23 = vpop.permute.xlu0 %1926  ;;  %v2067_v34 = vmul.f32 %v3214_v1, %v4337_v46  ;;  %v3311_v1 = vld [vmem:[%s4642_s5 + $0x10] sm:$0xff] }
 0x4b3   :  { %3219 = vrcp.f32 %v1927_v23  ;;  %v3312_v23 = vld [vmem:[%s4642_s5 + $0x90] sm:$0xff] }
 0x4b4   :  { %v4405_v15 = vmul.f32 %v2067_v34, %v3816_v8  ;;  %v3038_v34 = vpack.i.bf16 %v3311_v1, %v3312_v23  ;;  %v3317_v23 = vld [vmem:[%s4642_s5 + $0x28] sm:$0xff] }
 0x4b5   :  { %v3216_v17 = vpop.eup %3215 }
 0x4b6   :  { %v1932_v3 = vpop.permute.xlu1 %1931  ;;  %v2956_v31 = vpack.c.bf16 %v4405_v15, %v4401_v26  ;;  %v2069_v46 = vmul.f32 %v3216_v17, %v4339_v27  ;;  %v4666_v15 = vld [vmem:[#allocation9_spill] sm:$0xff] }
 0x4b7   :  { %3221 = vrcp.f32 %v1932_v3  ;;  %v3314_v3 = vld [vmem:[%s4642_s5 + $0x98] sm:$0xff] }
 0x4b8   :  { %v4417_v8 = vmul.f32 %v2069_v46, %v3828_v12 }
 0x4b9   :  { %v3218_v0 = vpop.eup %3217  ;;  %3035 = vxpose.xlu0.b32.start [1/16] %v3034_v5, 128  ;;  %v3313_v5 = vld [vmem:[%s4642_s5 + $0x18] sm:$0xff] }
 0x4ba   :  { %v1937_v29 = vpop.permute.xlu0 %1936  ;;  %v2071_v6 = vmul.f32 %v3218_v0, %v4341_v40  ;;  %v3040_v46 = vpack.i.bf16 %v3313_v5, %v3314_v3  ;;  %v3319_v5 = vld [vmem:[%s4642_s5 + $0x30] sm:$0xff] }
 0x4bb   :  { %3223 = vrcp.f32 %v1937_v29  ;;  %v3320_v3 = vld [vmem:[%s4642_s5 + $0xb0] sm:$0xff] }
 0x4bc   :  { %v4427_v27 = vmul.f32 %v2071_v6, %v3840_v16 }
 0x4bd   :  { %v3220_v12 = vpop.eup %3219  ;;  %3037 = vxpose.xlu0.b32.cont [2/16] %v3036_v59, 128  ;;  %v3316_v59 = vld [vmem:[%s4642_s5 + $0xa0] sm:$0xff] }
 0x4be   :  { %v1942_v17 = vpop.permute.xlu1 %1941  ;;  %v2960_v33 = vpack.c.bf16 %v4427_v27, %v4417_v8  ;;  %v2073_v40 = vmul.f32 %v3220_v12, %v4343_v60  ;;  %v3042_v29 = vpack.i.bf16 %v3315_v2, %v3316_v59  ;;  %v3321_v2 = vld [vmem:[%s4642_s5 + $0x38] sm:$0xff]  ;;  %v4668_v27 = vld [vmem:[#allocation11_spill] sm:$0xff] }
 0x4bf   :  { %3225 = vrcp.f32 %v1942_v17  ;;  %v3322_v59 = vld [vmem:[%s4642_s5 + $0xb8] sm:$0xff] }
 0x4c0   :  { %v4439_v16 = vmul.f32 %v2073_v40, %v3852_v20 }
 0x4c1   :  { %v3222_v63 = vpop.eup %3221  ;;  %3039 = vxpose.xlu0.b32.cont [3/16] %v3038_v34, 128  ;;  %v3318_v34 = vld [vmem:[%s4642_s5 + $0xa8] sm:$0xff] }
 0x4c2   :  { %v1947_v0 = vpop.permute.xlu0 %1946  ;;  %v2075_v21 = vmul.f32 %v3222_v63, %v4345_v4  ;;  %v3044_v17 = vpack.i.bf16 %v3317_v23, %v3318_v34  ;;  %v3324_v23 = vld [vmem:[%s4642_s5 + $0xc0] sm:$0xff] }
 0x4c3   :  { %3227 = vrcp.f32 %v1947_v0 }
 0x4c4   :  { %v4449_v60 = vmul.f32 %v2075_v21, %v3864_v24 }
 0x4c5   :  { %v3224_v20 = vpop.eup %3223  ;;  %3041 = vxpose.xlu0.b32.cont [4/16] %v3040_v46, 128  ;;  %v3046_v46 = vpack.i.bf16 %v3319_v5, %v3320_v3  ;;  %v3326_v5 = vld [vmem:[%s4642_s5 + $0xc8] sm:$0xff] }
 0x4c6   :  { %v1952_v6 = vpop.permute.xlu1 %1951  ;;  %v2964_v12 = vpack.c.bf16 %v4449_v60, %v4439_v16  ;;  %v2077_v4 = vmul.f32 %v3224_v20, %v4347_v25  ;;  %v4670_v60 = vld [vmem:[#allocation13_spill] sm:$0xff] }
 0x4c7   :  { %3229 = vrcp.f32 %v1952_v6 }
 0x4c8   :  { %v4461_v24 = vmul.f32 %v2077_v4, %v3876_v28 }
 0x4c9   :  { %v3226_v1 = vpop.eup %3225  ;;  %3043 = vxpose.xlu0.b32.cont [5/16] %v3042_v29, 128  ;;  %v3048_v29 = vpack.i.bf16 %v3321_v2, %v3322_v59 }
 0x4ca   :  { %v1957_v40 = vpop.permute.xlu0 %1956  ;;  %v2079_v63 = vmul.f32 %v3226_v1, %v4349_v10  ;;  %v3323_v1 = vld [vmem:[%s4642_s5 + $0x40] sm:$0xff] }
 0x4cb   :  { %3231 = vrcp.f32 %v1957_v40  ;;  %v3050_v34 = vpack.i.bf16 %v3323_v1, %v3324_v23 }
 0x4cc   :  { %v4471_v25 = vmul.f32 %v2079_v63, %v3888_v32 }
 0x4cd   :  { %v3228_v28 = vpop.eup %3227  ;;  %3045 = vxpose.xlu0.b32.cont [6/16] %v3044_v17, 128 }
 0x4ce   :  { %v1962_v0 = vpop.permute.xlu1 %1961  ;;  %v2968_v21 = vpack.c.bf16 %v4471_v25, %v4461_v24  ;;  %v2081_v10 = vmul.f32 %v3228_v28, %v4351_v49  ;;  %v3325_v28 = vld [vmem:[%s4642_s5 + $0x48] sm:$0xff]  ;;  %v4672_v25 = vld [vmem:[#allocation15_spill] sm:$0xff] }
 0x4cf   :  { %3233 = vrcp.f32 %v1962_v0  ;;  %v3052_v3 = vpack.i.bf16 %v3325_v28, %v3326_v5  ;;  %v3333_v5 = vld [vmem:[%s4642_s5 + $0x68] sm:$0xff] }
 0x4d0   :  { %v4483_v32 = vmul.f32 %v2081_v10, %v3897_v35  ;;  %v3327_v10 = vld [vmem:[%s4642_s5 + $0x50] sm:$0xff] }
 0x4d1   :  { %v3230_v20 = vpop.eup %3229  ;;  %3047 = vxpose.xlu0.b32.cont [7/16] %v3046_v46, 128 }
 0x4d2   :  { %v1967_v6 = vpop.permute.xlu0 %1966  ;;  %v2083_v4 = vmul.f32 %v3230_v20, %v4353_v11  ;;  %v3328_v20 = vld [vmem:[%s4642_s5 + $0xd0] sm:$0xff] }
 0x4d3   :  { %3235 = vrcp.f32 %v1967_v6  ;;  %v3054_v2 = vpack.i.bf16 %v3327_v10, %v3328_v20  ;;  %v3329_v6 = vld [vmem:[%s4642_s5 + $0x58] sm:$0xff] }
 0x4d4   :  { %v4493_v49 = vmul.f32 %v2083_v4, %v3901_v37  ;;  %v3330_v4 = vld [vmem:[%s4642_s5 + $0xd8] sm:$0xff] }
 0x4d5   :  { %v3232_v35 = vpop.eup %3231  ;;  %3049 = vxpose.xlu0.b32.cont [8/16] %v3048_v29, 128 }
 0x4d6   :  { %v1972_v17 = vpop.permute.xlu1 %1971  ;;  %v2972_v40 = vpack.c.bf16 %v4493_v49, %v4483_v32  ;;  %v2085_v11 = vmul.f32 %v3232_v35, %v4355_v7  ;;  %v3056_v35 = vpack.i.bf16 %v3329_v6, %v3330_v4  ;;  %v3337_v6 = vld [vmem:[%s4642_s5 + $0x78] sm:$0xff]  ;;  %v4674_v49 = vld [vmem:[#allocation17_spill] sm:$0xff] }
 0x4d7   :  { %3237 = vrcp.f32 %v1972_v17  ;;  %v3332_v17 = vld [vmem:[%s4642_s5 + $0xe0] sm:$0xff]  ;;  %v3338_v4 = vld [vmem:[%s4642_s5 + $0xf8] sm:$0xff] }
 0x4d8   :  { %v4505_v37 = vmul.f32 %v2085_v11, %v3905_v39 }
 0x4d9   :  { %v3234_v63 = vpop.eup %3233  ;;  %3051 = vxpose.xlu0.b32.cont [9/16] %v3050_v34, 128  ;;  %v3331_v34 = vld [vmem:[%s4642_s5 + $0x60] sm:$0xff] }
 0x4da   :  { %v1977_v46 = vpop.permute.xlu0 %1976  ;;  %v2087_v0 = vmul.f32 %v3234_v63, %v4357_v22  ;;  %v3058_v11 = vpack.i.bf16 %v3331_v34, %v3332_v17 }
 0x4db   :  { %3239 = vrcp.f32 %v1977_v46 }
 0x4dc   :  { %v4515_v7 = vmul.f32 %v2087_v0, %v3909_v41 }
 0x4dd   :  { %v3236_v39 = vpop.eup %3235  ;;  %3053 = vxpose.xlu0.b32.cont [10/16] %v3052_v3, 128  ;;  %v3334_v3 = vld [vmem:[%s4642_s5 + $0xe8] sm:$0xff] }
 0x4de   :  { %v2976_v59 = vpack.c.bf16 %v4515_v7, %v4505_v37  ;;  %v2089_v22 = vmul.f32 %v3236_v39, %v4359_v19  ;;  %v3060_v46 = vpack.i.bf16 %v3333_v5, %v3334_v3  ;;  %v4676_v7 = vld [vmem:[#allocation19_spill] sm:$0xff] }
 0x4e0   :  { %v4527_v29 = vmul.f32 %v2089_v22, %v3913_v43 }
 0x4e1   :  { %v3238_v41 = vpop.eup %3237  ;;  %3055 = vxpose.xlu0.b32.cont [11/16] %v3054_v2, 128 }
 0x4e2   :  { %v1987_v1 = vpop.permute.xlu1 %1986  ;;  %v2091_v23 = vmul.f32 %v3238_v41, %v4361_v57 }
 0x4e3   :  { %3241 = vrcp.f32 %v1987_v1 }
 0x4e4   :  { %v4537_v19 = vmul.f32 %v2091_v23, %v3917_v45 }
 0x4e5   :  { %v3240_v43 = vpop.eup %3239  ;;  %3057 = vxpose.xlu0.b32.cont [12/16] %v3056_v35, 128  ;;  %v3064_v35 = vpack.i.bf16 %v3337_v6, %v3338_v4 }
 0x4e6   :  { %v1992_v63 = vpop.permute.xlu0 %1991  ;;  %v2980_v28 = vpack.c.bf16 %v4537_v19, %v4527_v29  ;;  %v2093_v57 = vmul.f32 %v3240_v43, %v4363_v58  ;;  %v3335_v58 = vld [vmem:[%s4642_s5 + $0x70] sm:$0xff] }
 0x4e7   :  { %3243 = vrcp.f32 %v1992_v63 }
 0x4e8   :  { %v4549_v45 = vmul.f32 %v2093_v57, %v3921_v47  ;;  %v3336_v47 = vld [vmem:[%s4642_s5 + $0xf0] sm:$0xff]  ;;  %s3366_s5 = smov [#allocation2]  }
 0x4e9   :  { %3059 = vxpose.xlu0.b32.cont [13/16] %v3058_v11, 128  ;;  %v3062_v10 = vpack.i.bf16 %v3335_v58, %v3336_v47  ;;  %v4663_v11 = vld [vmem:[#allocation6_spill] sm:$0xff]  ;;  %v4665_v58 = vld [vmem:[#allocation8_spill] sm:$0xff]  ;;  %s2486_s8 = sshll.u32 %s3366_s5, 4  ;;  %s2487_s8 = int_to_ptr.vmem [resolvable:$true] %s2486_s8 }
 0x4ea   :  { %v1997_v0 = vpop.permute.xlu1 %1996  ;;  %s3339_s9 = scalar_lea.vmem %s2487_s8, 2048  ;;  %p3344_p1 = scmp.lt.s32.totalorder %s2487_s8, %s2487_s8 }
 0x4eb   :  { %3245 = vrcp.f32 %v1997_v0  ;;  %p3340_p0 = scmp.ne.s32.totalorder %s2487_s8, %s3339_s9  ;;  %p3345_p2 = scmp.lt.s32.totalorder %s3339_s9, %s3339_s9 }
 0x4ed   :  { %v3242_v39 = vpop.eup %3241  ;;  %3061 = vxpose.xlu0.b32.cont [14/16] %v3060_v46, 128  ;;  %p3346_p3 = por %p3345_p2, %p3344_p1 }
 0x4ee   :  { %v2002_v20 = vpop.permute.xlu1 %2001  ;;  %v2097_v2 = vmul.f32 %v3242_v39, %v4367_v52 }
 0x4ef   :  { %3247 = vrcp.f32 %v2002_v20  ;;  %p3347_p4 = pnand %p3346_p3, %p3340_p0 }
 0x4f0   :  { %v2144_v22 = vmul.f32 %v2097_v2, %v3929_v51 }
 0x4f1   :  { %v3244_v41 = vpop.eup %3243  ;;  %3063 = vxpose.xlu0.b32.cont [15/16] %v3062_v10, 128 }
 0x4f2   :  { %v2007_v1 = vpop.permute.xlu1 %2006  ;;  %v2099_v23 = vmul.f32 %v3244_v41, %v4369_v14  ;;  %v4667_v41 = vld [vmem:[#allocation10_spill] sm:$0xff] }
 0x4f3   :  { %3249 = vrcp.f32 %v2007_v1 }
 0x4f4   :  { %v2145_v52 = vmul.f32 %v2099_v23, %v3933_v53  ;;  %v4664_v53 = vld [vmem:[#allocation7_spill] sm:$0xff] }
 0x4f5   :  { %v3246_v43 = vpop.eup %3245  ;;  %3065 = vxpose.xlu0.b32.end [16/16] %v3064_v35, 128 }
 0x4f6   :  { %v2012_v51 = vpop.permute.xlu1 %2011  ;;  %v2954_v34 = vpack.c.bf16 %v2145_v52, %v2144_v22  ;;  %v2101_v17 = vmul.f32 %v3246_v43, %v4371_v62  ;;  %v4669_v52 = vld [vmem:[#allocation12_spill] sm:$0xff] }
 0x4f7   :  { %3251 = vrcp.f32 %v2012_v51 }
 0x4f8   :  { %2955 = vmatprep.subr.bf16.mxu0 %v2954_v34  ;;  %v2146_v63 = vmul.f32 %v2101_v17, %v4663_v11 }
 0x4f9   :  { %v3248_v57 = vpop.eup %3247  ;;  %2957 = vmatpush3.bf16.msra.mxu0 %v2956_v31 }
 0x4fa   :  { %v2017_v5 = vpop.permute.xlu0 %2016  ;;  %v2103_v14 = vmul.f32 %v3248_v57, %v4373_v42 }
 0x4fb   :  { %3253 = vrcp.f32 %v2017_v5 }
 0x4fc   :  { %v2147_v3 = vmul.f32 %v2103_v14, %v4664_v53 }
 0x4fd   :  { %v3250_v46 = vpop.eup %3249 }
 0x4fe   :  { %v2022_v0 = vpop.permute.xlu1 %2021  ;;  %v2958_v39 = vpack.c.bf16 %v2147_v3, %v2146_v63  ;;  %v2105_v62 = vmul.f32 %v3250_v46, %v4375_v56  ;;  %v4671_v63 = vld [vmem:[#allocation14_spill] sm:$0xff]  ;;  %v4673_v46 = vld [vmem:[#allocation16_spill] sm:$0xff] }
 0x4ff   :  { %3255 = vrcp.f32 %v2022_v0 }
 0x500   :  { %2959 = vmatprep.subr.bf16.mxu0 %v2958_v39  ;;  %v2148_v47 = vmul.f32 %v2105_v62, %v4665_v58 }
 0x501   :  { %v3252_v10 = vpop.eup %3251  ;;  %2961 = vmatpush3.bf16.msra.mxu0 %v2960_v33 }
 0x502   :  { %v2027_v26 = vpop.permute.xlu0 %2026  ;;  %v2107_v42 = vmul.f32 %v3252_v10, %v4377_v18 }
 0x503   :  { %3257 = vrcp.f32 %v2027_v26 }
 0x504   :  { %v2149_v31 = vmul.f32 %v2107_v42, %v4666_v15 }
 0x505   :  { %v3254_v20 = vpop.eup %3253 }
 0x506   :  { %v2032_v2 = vpop.permute.xlu1 %2031  ;;  %v2962_v22 = vpack.c.bf16 %v2149_v31, %v2148_v47  ;;  %v2109_v56 = vmul.f32 %v3254_v20, %v4379_v36  ;;  %v4677_v31 = vld [vmem:[#allocation5_spill] sm:$0xff] }
 0x507   :  { %3259 = vrcp.f32 %v2032_v2 }
 0x508   :  { %2963 = vmatprep.subr.bf16.mxu0 %v2962_v22  ;;  %v2150_v6 = vmul.f32 %v2109_v56, %v4667_v41 }
 0x509   :  { %v3256_v4 = vpop.eup %3255  ;;  %2965 = vmatpush3.bf16.msra.mxu0 %v2964_v12 }
 0x50a   :  { %v2037_v8 = vpop.permute.xlu0 %2036  ;;  %v2111_v18 = vmul.f32 %v3256_v4, %v4381_v9 }
 0x50b   :  { %3261 = vrcp.f32 %v2037_v8 }
 0x50c   :  { %v2151_v33 = vmul.f32 %v2111_v18, %v4668_v27 }
 0x50d   :  { %v3258_v35 = vpop.eup %3257 }
 0x50e   :  { %v2042_v1 = vpop.permute.xlu1 %2041  ;;  %v2966_v23 = vpack.c.bf16 %v2151_v33, %v2150_v6  ;;  %v2113_v36 = vmul.f32 %v3258_v35, %v4383_v55 }
 0x50f   :  { %3263 = vrcp.f32 %v2042_v1 }
 0x510   :  { %2967 = vmatprep.subr.bf16.mxu0 %v2966_v23  ;;  %v2152_v43 = vmul.f32 %v2113_v36, %v4669_v52 }
 0x511   :  { %v3260_v51 = vpop.eup %3259  ;;  %2969 = vmatpush3.bf16.msra.mxu0 %v2968_v21 }
 0x512   :  { %v2047_v16 = vpop.permute.xlu0 %2046  ;;  %v2115_v9 = vmul.f32 %v3260_v51, %v4385_v13 }
 0x513   :  { %3265 = vrcp.f32 %v2047_v16 }
 0x514   :  { %v2153_v12 = vmul.f32 %v2115_v9, %v4670_v60 }
 0x515   :  { %v3262_v34 = vpop.eup %3261 }
 0x516   :  { %v2052_v17 = vpop.permute.xlu1 %2051  ;;  %v2970_v11 = vpack.c.bf16 %v2153_v12, %v2152_v43  ;;  %v2117_v55 = vmul.f32 %v3262_v34, %v4387_v50 }
 0x517   :  { %3267 = vrcp.f32 %v2052_v17 }
 0x518   :  { %2971 = vmatprep.subr.bf16.mxu0 %v2970_v11  ;;  %v2154_v57 = vmul.f32 %v2117_v55, %v4671_v63 }
 0x519   :  { %v3264_v5 = vpop.eup %3263  ;;  %2973 = vmatpush3.bf16.msra.mxu0 %v2972_v40 }
 0x51a   :  { %v2057_v24 = vpop.permute.xlu0 %2056  ;;  %v2119_v13 = vmul.f32 %v3264_v5, %v4389_v44 }
 0x51b   :  { %3269 = vrcp.f32 %v2057_v24 }
 0x51c   :  { %v2155_v21 = vmul.f32 %v2119_v13, %v4672_v25 }
 0x51d   :  { %v3266_v14 = vpop.eup %3265 }
 0x51e   :  { %v2062_v53 = vpop.permute.xlu1 %2061  ;;  %v2974_v3 = vpack.c.bf16 %v2155_v21, %v2154_v57  ;;  %v2121_v50 = vmul.f32 %v3266_v14, %v4391_v54  ;;  %v4675_v54 = vld [vmem:[#allocation18_spill] sm:$0xff] }
 0x51f   :  { %3271 = vrcp.f32 %v2062_v53 }
 0x520   :  { %2975 = vmatprep.subr.bf16.mxu0 %v2974_v3  ;;  %v2156_v0 = vmul.f32 %v2121_v50, %v4673_v46 }
 0x521   :  { %v3268_v39 = vpop.eup %3267  ;;  %2977 = vmatpush3.bf16.msra.mxu0 %v2976_v59 }
 0x522   :  { %v1982_v32 = vpop.permute.xlu1 %1981  ;;  %v2123_v44 = vmul.f32 %v3268_v39, %v4393_v48 }
 0x523   :  { %3273 = vrcp.f32 %v1982_v32 }
 0x524   :  { %v2157_v40 = vmul.f32 %v2123_v44, %v4674_v49 }
 0x525   :  { %v3270_v62 = vpop.eup %3269 }
 0x526   :  { %v2978_v58 = vpack.c.bf16 %v2157_v40, %v2156_v0  ;;  %v2125_v47 = vmul.f32 %v3270_v62, %v4395_v38 }
 0x528   :  { %2979 = vmatprep.subr.bf16.mxu0 %v2978_v58  ;;  %v2158_v10 = vmul.f32 %v2125_v47, %v4675_v54 }
 0x529   :  { %v3272_v26 = vpop.eup %3271  ;;  %2981 = vmatpush3.bf16.msra.mxu0 %v2980_v28 }
 0x52a   :  { %v2127_v37 = vmul.f32 %v3272_v26, %v4397_v30 }
 0x52c   :  { %v2159_v59 = vmul.f32 %v2127_v37, %v4676_v7 }
 0x52d   :  { %v3274_v48 = vpop.eup %3273 }
 0x52e   :  { %v2095_v42 = vmul.f32 %v3274_v48, %v4365_v61  ;;  %v2982_v15 = vpack.c.bf16 %v2159_v59, %v2158_v10 }
 0x530   :  { %2983 = vmatprep.subr.bf16.mxu0 %v2982_v15  ;;  %v2143_v20 = vmul.f32 %v2095_v42, %v4677_v31 }
 0x532   :  { %v2984_v38 = vpack.c.bf16 %v2143_v20, %v4549_v45 }
 0x534   :  { %2985 = vmatpush3.bf16.msra.mxu0 %v2984_v38 }
 0x539   :  { %v3066_v2 = vpop.trf.xlu0 }
 0x53a   :  { %v3070_v22 = vunpack.i.h.bf16 %v3066_v2  ;;  %v3067_v56 = vunpack.i.l.bf16 %v3066_v2 }
 0x53c   :  { %2288 = vmatprep.mubr.f32.mxu0 %v3067_v56 }
 0x53d   :  { %v3071_v29 = vpop.trf.xlu0  ;;  %2289 = vmatmul.mubr.f32.vlgmr.msra.gmra.mrb[96].mxu0 %v3070_v22 }
 0x53e   :  { %v3072_v19 = vunpack.i.l.bf16 %v3071_v29  ;;  %v3075_v30 = vunpack.i.h.bf16 %v3071_v29 }
 0x540   :  { %2293 = vmatprep.mubr.f32.mxu0 %v3072_v19 }
 0x541   :  { %v3076_v28 = vpop.trf.xlu0  ;;  %2294 = vmatmul.mubr.f32.gmra.mrb[98].mxu0 %v3075_v30 }
 0x542   :  { %v3077_v41 = vunpack.i.l.bf16 %v3076_v28  ;;  %v3080_v61 = vunpack.i.h.bf16 %v3076_v28 }
 0x544   :  { %2298 = vmatprep.mubr.f32.mxu0 %v3077_v41 }
 0x545   :  { %v3081_v6 = vpop.trf.xlu0  ;;  %2299 = vmatmul.mubr.f32.gmra.mrb[100].mxu0 %v3080_v61 }
 0x546   :  { %v3082_v4 = vunpack.i.l.bf16 %v3081_v6  ;;  %v3085_v8 = vunpack.i.h.bf16 %v3081_v6 }
 0x548   :  { %2303 = vmatprep.mubr.f32.mxu0 %v3082_v4 }
 0x549   :  { %v3086_v45 = vpop.trf.xlu0  ;;  %2304 = vmatmul.mubr.f32.gmra.mrb[102].mxu0 %v3085_v8 }
 0x54a   :  { %v3087_v18 = vunpack.i.l.bf16 %v3086_v45  ;;  %v3090_v27 = vunpack.i.h.bf16 %v3086_v45 }
 0x54c   :  { %2308 = vmatprep.mubr.f32.mxu0 %v3087_v18 }
 0x54d   :  { %v3091_v33 = vpop.trf.xlu0  ;;  %2309 = vmatmul.mubr.f32.gmra.mrb[104].mxu0 %v3090_v27 }
 0x54e   :  { %v3092_v35 = vunpack.i.l.bf16 %v3091_v33  ;;  %v3095_v1 = vunpack.i.h.bf16 %v3091_v33 }
 0x550   :  { %2313 = vmatprep.mubr.f32.mxu0 %v3092_v35 }
 0x551   :  { %v3096_v23 = vpop.trf.xlu0  ;;  %2314 = vmatmul.mubr.f32.gmra.mrb[106].mxu0 %v3095_v1 }
 0x552   :  { %v3097_v36 = vunpack.i.l.bf16 %v3096_v23  ;;  %v3100_v52 = vunpack.i.h.bf16 %v3096_v23 }
 0x554   :  { %2318 = vmatprep.mubr.f32.mxu0 %v3097_v36 }
 0x555   :  { %v3101_v43 = vpop.trf.xlu0  ;;  %2319 = vmatmul.mubr.f32.gmra.mrb[108].mxu0 %v3100_v52 }
 0x556   :  { %v3102_v51 = vunpack.i.l.bf16 %v3101_v43  ;;  %v3105_v16 = vunpack.i.h.bf16 %v3101_v43 }
 0x558   :  { %2323 = vmatprep.mubr.f32.mxu0 %v3102_v51 }
 0x559   :  { %v3106_v9 = vpop.trf.xlu0  ;;  %2324 = vmatmul.mubr.f32.gmra.mrb[110].mxu0 %v3105_v16 }
 0x55a   :  { %v3107_v60 = vunpack.i.l.bf16 %v3106_v9  ;;  %v3110_v12 = vunpack.i.h.bf16 %v3106_v9 }
 0x55c   :  { %2328 = vmatprep.mubr.f32.mxu0 %v3107_v60 }
 0x55d   :  { %v3111_v34 = vpop.trf.xlu0  ;;  %2329 = vmatmul.mubr.f32.gmra.mrb[112].mxu0 %v3110_v12 }
 0x55e   :  { %v3112_v17 = vunpack.i.l.bf16 %v3111_v34  ;;  %v3115_v11 = vunpack.i.h.bf16 %v3111_v34 }
 0x560   :  { %2333 = vmatprep.mubr.f32.mxu0 %v3112_v17 }
 0x561   :  { %v3116_v55 = vpop.trf.xlu0  ;;  %2334 = vmatmul.mubr.f32.gmra.mrb[114].mxu0 %v3115_v11 }
 0x562   :  { %v3117_v63 = vunpack.i.l.bf16 %v3116_v55  ;;  %v3120_v57 = vunpack.i.h.bf16 %v3116_v55 }
 0x564   :  { %2338 = vmatprep.mubr.f32.mxu0 %v3117_v63 }
 0x565   :  { %v3121_v5 = vpop.trf.xlu0  ;;  %2339 = vmatmul.mubr.f32.gmra.mrb[116].mxu0 %v3120_v57 }
 0x566   :  { %v3122_v24 = vunpack.i.l.bf16 %v3121_v5  ;;  %v3125_v13 = vunpack.i.h.bf16 %v3121_v5 }
 0x568   :  { %2343 = vmatprep.mubr.f32.mxu0 %v3122_v24 }
 0x569   :  { %v3126_v25 = vpop.trf.xlu0  ;;  %2344 = vmatmul.mubr.f32.gmra.mrb[118].mxu0 %v3125_v13 }
 0x56a   :  { %v3127_v21 = vunpack.i.l.bf16 %v3126_v25  ;;  %v3130_v14 = vunpack.i.h.bf16 %v3126_v25 }
 0x56c   :  { %2348 = vmatprep.mubr.f32.mxu0 %v3127_v21 }
 0x56d   :  { %v3131_v53 = vpop.trf.xlu0  ;;  %2349 = vmatmul.mubr.f32.gmra.mrb[120].mxu0 %v3130_v14 }
 0x56e   :  { %v3132_v3 = vunpack.i.l.bf16 %v3131_v53  ;;  %v3135_v50 = vunpack.i.h.bf16 %v3131_v53 }
 0x570   :  { %2353 = vmatprep.mubr.f32.mxu0 %v3132_v3 }
 0x571   :  { %v3136_v46 = vpop.trf.xlu0  ;;  %2354 = vmatmul.mubr.f32.gmra.mrb[122].mxu0 %v3135_v50 }
 0x572   :  { %v3137_v0 = vunpack.i.l.bf16 %v3136_v46  ;;  %v3140_v39 = vunpack.i.h.bf16 %v3136_v46 }
 0x574   :  { %2358 = vmatprep.mubr.f32.mxu0 %v3137_v0 }
 0x575   :  { %v3141_v32 = vpop.trf.xlu0  ;;  %2359 = vmatmul.mubr.f32.gmra.mrb[124].mxu0 %v3140_v39 }
 0x576   :  { %v3145_v44 = vunpack.i.h.bf16 %v3141_v32  ;;  %v3142_v49 = vunpack.i.l.bf16 %v3141_v32 }
 0x578   :  { %2363 = vmatprep.mubr.f32.mxu0 %v3142_v49 }
 0x579   :  { %2364 = vmatmul.mubr.f32.gmra.mrb[126].mxu0 %v3145_v44 }
 0x610   :  { %v2708_v40 = vpop.f32.mrb[96].mxu0 }
 0x611   :  { %v2709_v62 = vpop.f32.mrb[97].mxu0 }
 0x612   :  { %v2710_v58 = vadd.f32 %v2709_v62, %v2708_v40 }
 0x614   :  { %v2385_v47 = vmin.f32 %v2710_v58, 0.0  ;;  %v2711_v54 = vpop.f32.mrb[98].mxu0  ;;  %vm2369_vm4 = vcmp.gt.f32.partialorder %v2710_v58, 0.0 }
 0x615   :  { %v2712_v10 = vpop.f32.mrb[99].mxu0 }
 0x616   :  { %v2401_v26 = vmul.f32 1.442695, %v2385_v47  ;;  %v2713_v37 = vadd.f32 %v2712_v10, %v2711_v54 }
 0x618   :  { %3275 = vpow2.f32 %v2401_v26  ;;  %v2386_v7 = vmin.f32 %v2713_v37, 0.0  ;;  %v2714_v59 = vpop.f32.mrb[100].mxu0  ;;  %vm2370_vm6 = vcmp.gt.f32.partialorder %v2713_v37, 0.0 }
 0x619   :  { %v2715_v48 = vpop.f32.mrb[101].mxu0 }
 0x61a   :  { %v2403_v42 = vmul.f32 1.442695, %v2386_v7  ;;  %v2716_v15 = vadd.f32 %v2715_v48, %v2714_v59 }
 0x61c   :  { %3277 = vpow2.f32 %v2403_v42  ;;  %v2387_v31 = vmin.f32 %v2716_v15, 0.0  ;;  %v2717_v20 = vpop.f32.mrb[102].mxu0  ;;  %vm2371_vm7 = vcmp.gt.f32.partialorder %v2716_v15, 0.0 }
 0x61d   :  { %v2718_v38 = vpop.f32.mrb[103].mxu0 }
 0x61e   :  { %v2405_v2 = vmul.f32 1.442695, %v2387_v31  ;;  %v2719_v22 = vadd.f32 %v2718_v38, %v2717_v20 }
 0x620   :  { %3279 = vpow2.f32 %v2405_v2  ;;  %v2388_v56 = vmin.f32 %v2719_v22, 0.0  ;;  %v2720_v29 = vpop.f32.mrb[104].mxu0  ;;  %vm2372_vm8 = vcmp.gt.f32.partialorder %v2719_v22, 0.0 }
 0x621   :  { %v2721_v19 = vpop.f32.mrb[105].mxu0 }
 0x622   :  { %v3276_v30 = vpop.eup %3275  ;;  %v2407_v28 = vmul.f32 1.442695, %v2388_v56  ;;  %v2722_v41 = vadd.f32 %v2721_v19, %v2720_v29 }
 0x623   :  { %v2579_v61 = vadd.f32 -1.0, %v3276_v30 }
 0x624   :  { %3281 = vpow2.f32 %v2407_v28  ;;  %v2389_v6 = vmin.f32 %v2722_v41, 0.0  ;;  %v2723_v4 = vpop.f32.mrb[106].mxu0  ;;  %vm2373_vm9 = vcmp.gt.f32.partialorder %v2722_v41, 0.0 }
 0x625   :  { %v2449_v8 = vsel %vm2369_vm4, %v2710_v58, %v2579_v61  ;;  %v2724_v45 = vpop.f32.mrb[107].mxu0 }
 0x626   :  { %v3278_v18 = vpop.eup %3277  ;;  %2465 = vst [vmem:[#allocation2] sm:$0xff] %v2449_v8  ;;  %v2409_v27 = vmul.f32 1.442695, %v2389_v6  ;;  %v2725_v33 = vadd.f32 %v2724_v45, %v2723_v4 }
 0x627   :  { %v2580_v35 = vadd.f32 -1.0, %v3278_v18 }
 0x628   :  { %3283 = vpow2.f32 %v2409_v27  ;;  %v2390_v1 = vmin.f32 %v2725_v33, 0.0  ;;  %v2726_v23 = vpop.f32.mrb[108].mxu0  ;;  %vm2374_vm10 = vcmp.gt.f32.partialorder %v2725_v33, 0.0 }
 0x629   :  { %v2450_v36 = vsel %vm2370_vm6, %v2713_v37, %v2580_v35  ;;  %v2727_v52 = vpop.f32.mrb[109].mxu0 }
 0x62a   :  { %v3280_v43 = vpop.eup %3279  ;;  %2466 = vst [vmem:[#allocation2 + $0x8] sm:$0xff] %v2450_v36  ;;  %v2411_v51 = vmul.f32 1.442695, %v2390_v1  ;;  %v2728_v16 = vadd.f32 %v2727_v52, %v2726_v23 }
 0x62b   :  { %v2581_v9 = vadd.f32 -1.0, %v3280_v43 }
 0x62c   :  { %3285 = vpow2.f32 %v2411_v51  ;;  %v2391_v60 = vmin.f32 %v2728_v16, 0.0  ;;  %v2729_v12 = vpop.f32.mrb[110].mxu0  ;;  %vm2375_vm11 = vcmp.gt.f32.partialorder %v2728_v16, 0.0 }
 0x62d   :  { %v2451_v34 = vsel %vm2371_vm7, %v2716_v15, %v2581_v9  ;;  %v2730_v17 = vpop.f32.mrb[111].mxu0 }
 0x62e   :  { %v3282_v11 = vpop.eup %3281  ;;  %2467 = vst [vmem:[#allocation2 + $0x10] sm:$0xff] %v2451_v34  ;;  %v2413_v55 = vmul.f32 1.442695, %v2391_v60  ;;  %v2731_v63 = vadd.f32 %v2730_v17, %v2729_v12 }
 0x62f   :  { %v2582_v57 = vadd.f32 -1.0, %v3282_v11 }
 0x630   :  { %3287 = vpow2.f32 %v2413_v55  ;;  %v2392_v5 = vmin.f32 %v2731_v63, 0.0  ;;  %v2732_v24 = vpop.f32.mrb[112].mxu0  ;;  %vm2376_vm12 = vcmp.gt.f32.partialorder %v2731_v63, 0.0 }
 0x631   :  { %v2452_v13 = vsel %vm2372_vm8, %v2719_v22, %v2582_v57  ;;  %v2733_v25 = vpop.f32.mrb[113].mxu0 }
 0x632   :  { %v3284_v21 = vpop.eup %3283  ;;  %2468 = vst [vmem:[#allocation2 + $0x18] sm:$0xff] %v2452_v13  ;;  %v2415_v14 = vmul.f32 1.442695, %v2392_v5  ;;  %v2734_v53 = vadd.f32 %v2733_v25, %v2732_v24 }
 0x633   :  { %v2583_v3 = vadd.f32 -1.0, %v3284_v21 }
 0x634   :  { %3289 = vpow2.f32 %v2415_v14  ;;  %v2393_v50 = vmin.f32 %v2734_v53, 0.0  ;;  %v2735_v46 = vpop.f32.mrb[114].mxu0  ;;  %vm2377_vm13 = vcmp.gt.f32.partialorder %v2734_v53, 0.0 }
 0x635   :  { %v2453_v0 = vsel %vm2373_vm9, %v2722_v41, %v2583_v3  ;;  %v2736_v39 = vpop.f32.mrb[115].mxu0 }
 0x636   :  { %v3286_v32 = vpop.eup %3285  ;;  %2469 = vst [vmem:[#allocation2 + $0x20] sm:$0xff] %v2453_v0  ;;  %v2417_v44 = vmul.f32 1.442695, %v2393_v50  ;;  %v2737_v49 = vadd.f32 %v2736_v39, %v2735_v46 }
 0x637   :  { %v2584_v40 = vadd.f32 -1.0, %v3286_v32 }
 0x638   :  { %3291 = vpow2.f32 %v2417_v44  ;;  %v2394_v62 = vmin.f32 %v2737_v49, 0.0  ;;  %v2738_v58 = vpop.f32.mrb[116].mxu0  ;;  %vm2378_vm14 = vcmp.gt.f32.partialorder %v2737_v49, 0.0 }
 0x639   :  { %v2454_v47 = vsel %vm2374_vm10, %v2725_v33, %v2584_v40  ;;  %v2739_v54 = vpop.f32.mrb[117].mxu0 }
 0x63a   :  { %v3288_v10 = vpop.eup %3287  ;;  %2470 = vst [vmem:[#allocation2 + $0x28] sm:$0xff] %v2454_v47  ;;  %v2419_v26 = vmul.f32 1.442695, %v2394_v62  ;;  %v2740_v37 = vadd.f32 %v2739_v54, %v2738_v58 }
 0x63b   :  { %v2585_v7 = vadd.f32 -1.0, %v3288_v10 }
 0x63c   :  { %3293 = vpow2.f32 %v2419_v26  ;;  %v2395_v59 = vmin.f32 %v2740_v37, 0.0  ;;  %v2741_v48 = vpop.f32.mrb[118].mxu0  ;;  %vm2379_vm15 = vcmp.gt.f32.partialorder %v2740_v37, 0.0 }
 0x63d   :  { %v2455_v42 = vsel %vm2375_vm11, %v2728_v16, %v2585_v7  ;;  %v2742_v15 = vpop.f32.mrb[119].mxu0 }
 0x63e   :  { %v3290_v31 = vpop.eup %3289  ;;  %2471 = vst [vmem:[#allocation2 + $0x30] sm:$0xff] %v2455_v42  ;;  %v2421_v20 = vmul.f32 1.442695, %v2395_v59  ;;  %v2743_v38 = vadd.f32 %v2742_v15, %v2741_v48 }
 0x63f   :  { %v2586_v2 = vadd.f32 -1.0, %v3290_v31 }
 0x640   :  { %3295 = vpow2.f32 %v2421_v20  ;;  %v2396_v22 = vmin.f32 %v2743_v38, 0.0  ;;  %v2744_v56 = vpop.f32.mrb[120].mxu0  ;;  %vm2380_vm0 = vcmp.gt.f32.partialorder %v2743_v38, 0.0 }
 0x641   :  { %v2456_v29 = vsel %vm2376_vm12, %v2731_v63, %v2586_v2  ;;  %v2745_v19 = vpop.f32.mrb[121].mxu0 }
 0x642   :  { %v3292_v30 = vpop.eup %3291  ;;  %2472 = vst [vmem:[#allocation2 + $0x38] sm:$0xff] %v2456_v29  ;;  %v2423_v28 = vmul.f32 1.442695, %v2396_v22  ;;  %v2746_v41 = vadd.f32 %v2745_v19, %v2744_v56 }
 0x643   :  { %v2587_v61 = vadd.f32 -1.0, %v3292_v30 }
 0x644   :  { %3297 = vpow2.f32 %v2423_v28  ;;  %v2397_v6 = vmin.f32 %v2746_v41, 0.0  ;;  %v2747_v4 = vpop.f32.mrb[122].mxu0  ;;  %vm2381_vm1 = vcmp.gt.f32.partialorder %v2746_v41, 0.0 }
 0x645   :  { %v2457_v8 = vsel %vm2377_vm13, %v2734_v53, %v2587_v61  ;;  %v2748_v45 = vpop.f32.mrb[123].mxu0 }
 0x646   :  { %v3294_v18 = vpop.eup %3293  ;;  %2473 = vst [vmem:[#allocation2 + $0x40] sm:$0xff] %v2457_v8  ;;  %v2425_v27 = vmul.f32 1.442695, %v2397_v6  ;;  %v2749_v33 = vadd.f32 %v2748_v45, %v2747_v4 }
 0x647   :  { %v2588_v35 = vadd.f32 -1.0, %v3294_v18 }
 0x648   :  { %3299 = vpow2.f32 %v2425_v27  ;;  %v2398_v1 = vmin.f32 %v2749_v33, 0.0  ;;  %v2750_v23 = vpop.f32.mrb[124].mxu0  ;;  %vm2382_vm2 = vcmp.gt.f32.partialorder %v2749_v33, 0.0 }
 0x649   :  { %v2458_v36 = vsel %vm2378_vm14, %v2737_v49, %v2588_v35  ;;  %v2751_v52 = vpop.f32.mrb[125].mxu0 }
 0x64a   :  { %v3296_v43 = vpop.eup %3295  ;;  %2474 = vst [vmem:[#allocation2 + $0x48] sm:$0xff] %v2458_v36  ;;  %v2427_v51 = vmul.f32 1.442695, %v2398_v1  ;;  %v2752_v16 = vadd.f32 %v2751_v52, %v2750_v23 }
 0x64b   :  { %v2589_v9 = vadd.f32 -1.0, %v3296_v43 }
 0x64c   :  { %3301 = vpow2.f32 %v2427_v51  ;;  %v2399_v60 = vmin.f32 %v2752_v16, 0.0  ;;  %v2753_v12 = vpop.f32.mrb[126].mxu0  ;;  %vm2383_vm3 = vcmp.gt.f32.partialorder %v2752_v16, 0.0 }
 0x64d   :  { %v2459_v34 = vsel %vm2379_vm15, %v2740_v37, %v2589_v9  ;;  %v2754_v17 = vpop.f32.mrb[127].mxu0 }
 0x64e   :  { %v3298_v11 = vpop.eup %3297  ;;  %2475 = vst [vmem:[#allocation2 + $0x50] sm:$0xff] %v2459_v34  ;;  %v2429_v55 = vmul.f32 1.442695, %v2399_v60  ;;  %v2755_v63 = vadd.f32 %v2754_v17, %v2753_v12 }
 0x64f   :  { %v2590_v57 = vadd.f32 -1.0, %v3298_v11 }
 0x650   :  { %3303 = vpow2.f32 %v2429_v55  ;;  %v2400_v5 = vmin.f32 %v2755_v63, 0.0  ;;  %vm2384_vm5 = vcmp.gt.f32.partialorder %v2755_v63, 0.0 }
 0x651   :  { %v2460_v24 = vsel %vm2380_vm0, %v2743_v38, %v2590_v57 }
 0x652   :  { %v3300_v13 = vpop.eup %3299  ;;  %2476 = vst [vmem:[#allocation2 + $0x58] sm:$0xff] %v2460_v24  ;;  %v2431_v25 = vmul.f32 1.442695, %v2400_v5 }
 0x653   :  { %v2591_v21 = vadd.f32 -1.0, %v3300_v13 }
 0x654   :  { %3305 = vpow2.f32 %v2431_v25 }
 0x655   :  { %v2461_v14 = vsel %vm2381_vm1, %v2746_v41, %v2591_v21 }
 0x656   :  { %v3302_v53 = vpop.eup %3301  ;;  %2477 = vst [vmem:[#allocation2 + $0x60] sm:$0xff] %v2461_v14 }
 0x657   :  { %v2592_v3 = vadd.f32 -1.0, %v3302_v53 }
 0x659   :  { %v2462_v50 = vsel %vm2382_vm2, %v2749_v33, %v2592_v3 }
 0x65a   :  { %v3304_v46 = vpop.eup %3303  ;;  %2478 = vst [vmem:[#allocation2 + $0x68] sm:$0xff] %v2462_v50 }
 0x65b   :  { %v2593_v0 = vadd.f32 -1.0, %v3304_v46 }
 0x65d   :  { %v2463_v39 = vsel %vm2383_vm3, %v2752_v16, %v2593_v0 }
 0x65e   :  { %v3306_v32 = vpop.eup %3305  ;;  %2479 = vst [vmem:[#allocation2 + $0x70] sm:$0xff] %v2463_v39 }
 0x65f   :  { %v2594_v44 = vadd.f32 -1.0, %v3306_v32 }
 0x661   :  { %v2464_v49 = vsel %vm2384_vm5, %v2755_v63, %v2594_v44 }
 0x662   :  { %2480 = vst [vmem:[#allocation2 + $0x78] sm:$0xff] %v2464_v49 }
 0x663   :  { %3350 = shalt.err (!%p3347_p4)
}
 0x664   :  { %s3351_s1 = scalar_lea.hbm %s4644_s7, 2048 }
 0x665   :  { %p3352_p5 = scmp.ne.s32.totalorder %s4644_s7, %s3351_s1  ;;  %p3355_p6 = scmp.lt.u32.totalorder %s3351_s1, %s4644_s7 }
 0x667   :  { %p3357_p7 = pnand %p3355_p6, %p3352_p5 }
 0x669   :  { %3360 = shalt.err (!%p3357_p7)
}
 0x66a   :  { %s3367_s15 = smov 128   ;;  %s3368_s16 = smov 8  }
 0x66b   :  { %2492 = dma.vmem_to_hbm [thread:$0]  %s2487_s8, 2048, %s4644_s7, [#allocation3], %s3367_s15, %s3367_s15, %s3368_s16  }
 0x66c   :  { %3361 = dma.done.wait [#allocation3], 2048  }
 0x66d   :  { %3362 = vsyncadd [#allocation3], 4294965248 }
 0x66e   :  { %2496 = vsyncpa [#allocation3], 1 }

</bundles_post_ra>
